<compile_context>
chip_gen: v7x
topology: tpu7x:2x2x1
jax: 0.10.0
libtpu: 0.0.40
codegen_flags: <defaults>
</compile_context>

<pallas_src>
import functools

import jax
import jax.numpy as jnp
from jax.experimental import pallas as pl
from jax.experimental.pallas import tpu as pltpu


# ----------------------------------------------------------------------------
# Tile-size helpers (static, trace-time)
# ----------------------------------------------------------------------------
def _pick_gemm_tile(m_pad, k, cout, has_residual, budget_bytes=16 * 1024 * 1024):
    """Pick the lane-tile for the conv GEMM so double-buffered operands fit."""
    per_col = 2 * (2 * k) + 2 * (4 * cout) * (2 if has_residual else 1)
    cap = max(128, budget_bytes // max(per_col, 1))
    for cand in (4096, 2048, 1024, 512, 256, 128):
        if cand <= cap and m_pad % cand == 0:
            return cand
    return 128


def _pick_lane_tile(total, bytes_per_col, budget_bytes=16 * 1024 * 1024):
    """Pick a lane tile for the (C, N, HW) elementwise kernels."""
    if total % 128 != 0:
        return total  # small / odd extents: take the full axis as one block
    cap = max(128, budget_bytes // max(bytes_per_col, 1))
    for cand in (4096, 2048, 1024, 512, 256, 128):
        if cand <= cap and total % cand == 0:
            return cand
    return 128


# ----------------------------------------------------------------------------
# Pallas kernels
# ----------------------------------------------------------------------------
def _gemm_bias_act_kernel(*refs, act, has_residual, has_sum):
    """out = act(W @ X + bias [+ residual]); optionally also accumulate
    per-(channel, batch) spatial sums of the result via a segment matmul."""
    w_ref, x_ref, b_ref = refs[0], refs[1], refs[2]
    idx = 3
    r_ref = refs[idx] if has_residual else None
    idx += int(has_residual)
    s_ref = refs[idx] if has_sum else None
    idx += int(has_sum)
    o_ref = refs[idx]
    sums_ref = refs[idx + 1] if has_sum else None

    acc = jnp.dot(w_ref[...], x_ref[...], preferred_element_type=jnp.float32)
    acc = acc + b_ref[...]
    if has_residual:
        acc = acc + r_ref[...]
    if act == "relu":
        acc = jnp.maximum(acc, 0.0)
    elif act == "sigmoid":
        acc = jax.nn.sigmoid(acc)
    o_ref[...] = acc.astype(o_ref.dtype)

    if has_sum:
        @pl.when(pl.program_id(0) == 0)
        def _():
            sums_ref[...] = jnp.zeros_like(sums_ref)
        # Segment-sum over columns per batch: tiny (Cout, tm) @ (tm, N) matmul.
        # Padded columns have all-zero rows in S, so they are masked naturally.
        sums_ref[...] += jnp.dot(acc, s_ref[...],
                                 preferred_element_type=jnp.float32)


def _modulate_kernel(z_ref, zsum_ref, w1m_ref, b1m_ref, w2m_ref, b2m_ref,
                     w1a_ref, b1a_ref, w2a_ref, b2a_ref,
                     o_ref, fac_sc, add_sc, *, inv_hw):
    """Both modulation MLPs (from precomputed per-batch sums) + tiled apply."""
    @pl.when(pl.program_id(0) == 0)
    def _():
        z_mean = zsum_ref[...] * inv_hw                                 # (C, N)
        h_m = jnp.maximum(
            jnp.dot(w1m_ref[...], z_mean, preferred_element_type=jnp.float32)
            + b1m_ref[...], 0.0)
        fac_sc[...] = jax.nn.sigmoid(
            jnp.dot(w2m_ref[...], h_m, preferred_element_type=jnp.float32)
            + b2m_ref[...])
        h_a = jnp.maximum(
            jnp.dot(w1a_ref[...], z_mean, preferred_element_type=jnp.float32)
            + b1a_ref[...], 0.0)
        add_sc[...] = jnp.dot(w2a_ref[...], h_a, preferred_element_type=jnp.float32) \
            + b2a_ref[...]

    fac = fac_sc[...]
    add = add_sc[...]
    o_ref[...] = z_ref[...] * fac[:, :, None] + add[:, :, None]


# ----------------------------------------------------------------------------
# Kernel wrappers
# ----------------------------------------------------------------------------
def gemm_bias_act(w_mat, x_mat, bias_col, residual=None, act="none",
                  seg_sum_mat=None):
    """out = act(w_mat @ x_mat + bias [+ residual]); optional per-batch sums.

    w_mat: (Cout, K) bf16 (BN scale pre-folded), x_mat: (K, M) bf16,
    bias_col: (Cout, 1) f32, residual: (Cout, M) f32 or None,
    seg_sum_mat: (M_pad, N) f32 column->batch selection matrix or None.
    Returns (Cout, M) f32 [, (Cout, N) f32 sums].  M is the lane axis.
    """
    cout, k = w_mat.shape
    m = x_mat.shape[1]
    m_pad = ((m + 127) // 128) * 128
    if m_pad != m:
        x_mat = jnp.pad(x_mat, ((0, 0), (0, m_pad - m)))
        if residual is not None:
            residual = jnp.pad(residual, ((0, 0), (0, m_pad - m)))

    has_residual = residual is not None
    has_sum = seg_sum_mat is not None
    tm = _pick_gemm_tile(m_pad, k, cout, has_residual)
    grid = (m_pad // tm,)

    in_specs = [
        pl.BlockSpec((cout, k), lambda i: (0, 0)),     # weights: resident
        pl.BlockSpec((k, tm), lambda i: (0, i)),       # activation/patch tile
        pl.BlockSpec((cout, 1), lambda i: (0, 0)),     # bias: resident
    ]
    args = [w_mat, x_mat, bias_col]
    if has_residual:
        in_specs.append(pl.BlockSpec((cout, tm), lambda i: (0, i)))
        args.append(residual)
    if has_sum:
        nb = seg_sum_mat.shape[1]
        in_specs.append(pl.BlockSpec((tm, nb), lambda i: (i, 0)))
        args.append(seg_sum_mat)

    out_shapes = [jax.ShapeDtypeStruct((cout, m_pad), jnp.float32)]
    out_specs = [pl.BlockSpec((cout, tm), lambda i: (0, i))]
    if has_sum:
        out_shapes.append(jax.ShapeDtypeStruct((cout, nb), jnp.float32))
        out_specs.append(pl.BlockSpec((cout, nb), lambda i: (0, 0)))  # resident acc

    kernel = functools.partial(_gemm_bias_act_kernel, act=act,
                               has_residual=has_residual, has_sum=has_sum)
    # The resident sums accumulator requires sequential grid order.
    sem = "arbitrary" if has_sum else "parallel"
    result = pl.pallas_call(
        kernel,
        out_shape=tuple(out_shapes) if has_sum else out_shapes[0],
        grid=grid,
        in_specs=in_specs,
        out_specs=tuple(out_specs) if has_sum else out_specs[0],
        compiler_params=pltpu.CompilerParams(
            dimension_semantics=(sem,),
            vmem_limit_bytes=48 * 1024 * 1024),
    )(*args)

    if has_sum:
        out, sums = result
    else:
        out, sums = result, None
    out = out[:, :m] if m_pad != m else out
    return (out, sums) if has_sum else out


def conv2d_cf(x, w_oihw, *, stride, padding, pad_mode="zero",
              scale=None, bias=None, act="none", residual=None,
              compute_batch_sums=False):
    """Conv2d in channel-major layout.  x: (Cin, N, H, W) -> (Cout, N, OH, OW).

    BN scale is folded into the weights; bias is the folded BN bias (or the
    conv bias).  `residual` (same layout as the output) is added before `act`.
    If `compute_batch_sums`, also returns the per-(Cout, N) spatial sums of
    the output (fused into the GEMM epilogue).
    """
    cin, n, _, _ = x.shape
    cout, cin_w, kh, kw = w_oihw.shape
    assert cin == cin_w

    xb = x.astype(jnp.bfloat16)          # bf16 before im2col: half the traffic
    if padding > 0:
        mode = "reflect" if pad_mode == "reflect" else "constant"
        xp = jnp.pad(xb, ((0, 0), (0, 0), (padding, padding), (padding, padding)),
                     mode=mode)
    else:
        xp = xb
    hp, wp = xp.shape[2], xp.shape[3]
    oh = (hp - kh) // stride + 1
    ow = (wp - kw) // stride + 1

    # im2col (XLA glue, pure data movement): K-order (ci, ky, kx) matches
    # w_oihw.reshape(Cout, Cin*kh*kw); columns are (n, oh, ow).
    cols = [xp[:, :, ky:ky + (oh - 1) * stride + 1:stride,
                     kx:kx + (ow - 1) * stride + 1:stride]
            for ky in range(kh) for kx in range(kw)]
    patches = jnp.stack(cols, axis=1).reshape(cin * kh * kw, n * oh * ow)

    w_mat = w_oihw.reshape(cout, cin * kh * kw)
    if scale is not None:                # fold BN scale into weights (trace time)
        w_mat = w_mat * scale[:, None]
    bias_col = (jnp.zeros((cout,), jnp.float32) if bias is None else bias)
    bias_col = bias_col.reshape(cout, 1).astype(jnp.float32)

    m = n * oh * ow
    res_flat = None if residual is None else residual.reshape(cout, m)

    seg = None
    if compute_batch_sums:
        m_pad = ((m + 127) // 128) * 128
        col = jnp.arange(m_pad)
        valid = col < m
        seg = ((col[:, None] // (oh * ow)) == jnp.arange(n)[None, :]) & valid[:, None]
        seg = seg.astype(jnp.float32)    # (m_pad, N) 0/1 selection matrix

    out = gemm_bias_act(w_mat.astype(jnp.bfloat16), patches, bias_col,
                        residual=res_flat, act=act, seg_sum_mat=seg)
    if compute_batch_sums:
        out, sums = out
        return out.reshape(cout, n, oh, ow), sums
    return out.reshape(cout, n, oh, ow)


def modulate(zf, zsum, mod_params, snr):
    """zf: (C, N, HW) f32, zsum: (C, N) spatial sums, snr: (N, C_extend).

    Computes factor/addition MLPs once (SNR branch folded into per-batch
    biases at trace time) and applies zf * factor + addition, all in one
    pallas_call tiled over HW.
    """
    c, n, hw = zf.shape
    t = _pick_lane_tile(hw, bytes_per_col=4 * c * n * 4)

    # Fold the SNR branch of the first linears into per-batch biases.
    w1m = mod_params["mw1"].T                                   # (C, C+E)
    w1a = mod_params["aw1"].T
    b1m = w1m[:, c:] @ snr.T + mod_params["mb1"][:, None]       # (C, N)
    b1a = w1a[:, c:] @ snr.T + mod_params["ab1"][:, None]

    def small(shape):
        return pl.BlockSpec(shape, lambda i: (0,) * len(shape))

    kernel = functools.partial(_modulate_kernel, inv_hw=1.0 / hw)
    return pl.pallas_call(
        kernel,
        out_shape=jax.ShapeDtypeStruct((c, n, hw), jnp.float32),
        grid=(hw // t,),
        in_specs=[pl.BlockSpec((c, n, t), lambda i: (0, 0, i)),
                  small((c, n)),
                  small((c, c)), small((c, n)), small((c, c)), small((c, 1)),
                  small((c, c)), small((c, n)), small((c, c)), small((c, 1))],
        out_specs=pl.BlockSpec((c, n, t), lambda i: (0, 0, i)),
        scratch_shapes=[pltpu.VMEM((c, n), jnp.float32),
                        pltpu.VMEM((c, n), jnp.float32)],
        compiler_params=pltpu.CompilerParams(
            dimension_semantics=("arbitrary",),
            vmem_limit_bytes=48 * 1024 * 1024),
    )(zf, zsum, w1m[:, :c], b1m, mod_params["mw2"].T, mod_params["mb2"][:, None],
      w1a[:, :c], b1a, mod_params["aw2"].T, mod_params["ab2"][:, None])


def bn_fold(gamma, beta, mean, var, eps=1e-5):
    scale = gamma / jnp.sqrt(var + eps)
    bias = beta - mean * scale
    return scale, bias


# ----------------------------------------------------------------------------
# Deterministic parameter construction (mirrors JSCC_Encoder.__init__ shapes)
# ----------------------------------------------------------------------------
def make_params(key, *, input_nc, ngf, max_ngf, n_blocks, C_channel, C_extend,
                n_downsampling):
    keys = iter(jax.random.split(key, 256))

    def conv_w(cout, cin, kh, kw):
        fan_in = cin * kh * kw
        return jax.random.normal(next(keys), (cout, cin, kh, kw), jnp.float32) / jnp.sqrt(fan_in)

    def bn_params(c):
        gamma = 1.0 + 0.1 * jax.random.normal(next(keys), (c,), jnp.float32)
        beta = 0.1 * jax.random.normal(next(keys), (c,), jnp.float32)
        mean = 0.1 * jax.random.normal(next(keys), (c,), jnp.float32)
        var = 0.5 + 0.1 * jnp.abs(jax.random.normal(next(keys), (c,), jnp.float32))
        return (gamma, beta, mean, var)

    def lin(cin, cout):
        w = jax.random.normal(next(keys), (cin, cout), jnp.float32) / jnp.sqrt(cin)
        b = 0.1 * jax.random.normal(next(keys), (cout,), jnp.float32)
        return w, b

    params = {"head": {"w": conv_w(ngf, input_nc, 7, 7), "bn": bn_params(ngf)}}

    downs = []
    for i in range(n_downsampling):
        mult = 2 ** i
        cin = min(ngf * mult, max_ngf)
        cout = min(ngf * mult * 2, max_ngf)
        downs.append({"w": conv_w(cout, cin, 3, 3), "bn": bn_params(cout)})
    params["down"] = downs

    dim = min(ngf * (2 ** n_downsampling), max_ngf)
    blocks = []
    for _ in range(n_blocks):
        res = {"w1": conv_w(dim, dim, 3, 3), "bn1": bn_params(dim),
               "w2": conv_w(dim, dim, 3, 3), "bn2": bn_params(dim)}
        mw1, mb1 = lin(dim + C_extend, dim)
        mw2, mb2 = lin(dim, dim)
        aw1, ab1 = lin(dim + C_extend, dim)
        aw2, ab2 = lin(dim, dim)
        mod = {"mw1": mw1, "mb1": mb1, "mw2": mw2, "mb2": mb2,
               "aw1": aw1, "ab1": ab1, "aw2": aw2, "ab2": ab2}
        blocks.append({"res": res, "mod": mod})
    params["blocks"] = blocks

    params["proj"] = {"w": conv_w(C_channel, dim, 3, 3),
                      "b": 0.1 * jax.random.normal(next(keys), (C_channel,), jnp.float32)}
    return params


# ----------------------------------------------------------------------------
# Forward pass (matches JSCC_Encoder.forward)
# ----------------------------------------------------------------------------
def jscc_encoder_forward(params, x_nchw, snr):
    # Channel-major (C, N, H, W) internal layout: the flattened spatial axis
    # lands on the TPU lane dimension in every GEMM.
    x = jnp.transpose(x_nchw, (1, 0, 2, 3)).astype(jnp.float32)

    # self.net: ReflectionPad2d(3) + Conv7x7 (no bias) + BN + ReLU
    p = params["head"]
    s, b = bn_fold(*p["bn"])
    z = conv2d_cf(x, p["w"], stride=1, padding=3, pad_mode="reflect",
                  scale=s, bias=b, act="relu")

    # downsampling: Conv3x3 stride 2 (no bias) + BN + ReLU
    for p in params["down"]:
        s, b = bn_fold(*p["bn"])
        z = conv2d_cf(z, p["w"], stride=2, padding=1, scale=s, bias=b, act="relu")

    # [ResnetBlock, modulation] * n_blocks
    for blk in params["blocks"]:
        rb = blk["res"]
        s1, b1 = bn_fold(*rb["bn1"])
        h = conv2d_cf(z, rb["w1"], stride=1, padding=1, scale=s1, bias=b1, act="relu")
        s2, b2 = bn_fold(*rb["bn2"])
        # Residual conv also returns the per-batch spatial sums (fused epilogue).
        z, zsum = conv2d_cf(h, rb["w2"], stride=1, padding=1, scale=s2, bias=b2,
                            act="none", residual=z, compute_batch_sums=True)

        c, n, hgt, wid = z.shape
        zf = z.reshape(c, n, hgt * wid)
        z = modulate(zf, zsum, blk["mod"], snr).reshape(c, n, hgt, wid)

    # projection: Conv3x3 stride 1, with bias, no BN, no activation
    pr = params["proj"]
    latent = conv2d_cf(z, pr["w"], stride=1, padding=1,
                       scale=None, bias=pr["b"], act="none")
    return jnp.transpose(latent, (1, 0, 2, 3))  # -> NCHW, matching PyTorch


# ----------------------------------------------------------------------------
if __name__ == "__main__":
    # Small config consistent with the module:
    #   input_nc=3, ngf=8, max_ngf=32, n_blocks=2, C_channel=4, C_extend=1,
    #   n_downsampling=2
    key = jax.random.PRNGKey(0)
    kp, kx, ks = jax.random.split(key, 3)
    params = make_params(kp, input_nc=3, ngf=8, max_ngf=32, n_blocks=2,
                         C_channel=4, C_extend=1, n_downsampling=2)

    x = jax.random.normal(kx, (2, 3, 16, 16), jnp.float32)        # NCHW, like PyTorch
    snr = 20.0 * jax.random.uniform(ks, (2, 1), jnp.float32)      # CSI / SNR, (N, C_extend)

    fwd = jax.jit(jscc_encoder_forward)
    latent = fwd(params, x, snr)
    jax.block_until_ready(latent)
    assert latent.shape == (2, 4, 4, 4), latent.shape  # (N, C_channel, H/4, W/4)
    print("KERNEL_OK")
</pallas_src>

<mosaic_0001>
module attributes {stable_mosaic.version = 11 : i64} {
  func.func @_gemm_bias_act_kernel(%arg0: i32, %arg1: memref<8x147xbf16, #tpu.memory_space<vmem>>, %arg2: memref<147x512xbf16, #tpu.memory_space<vmem>>, %arg3: memref<8x1xf32, #tpu.memory_space<vmem>>, %arg4: memref<8x512xf32, #tpu.memory_space<vmem>>) attributes {dimension_semantics = [#tpu.dimension_semantics<parallel>], iteration_bounds = array<i64: 1>, scalar_prefetch = 0 : i64, scratch_operands = 0 : i64, tpu.core_type = #tpu.core_type<tc>, window_params = [{pipeline_mode = #tpu.pipeline_mode<synchronous>, transform_indices = @transform_0, window_bounds = array<i64: 8, 147>}, {transform_indices = @transform_1, window_bounds = array<i64: 147, 512>}, {pipeline_mode = #tpu.pipeline_mode<synchronous>, transform_indices = @transform_2, window_bounds = array<i64: 8, 1>}, {transform_indices = @transform_3, window_bounds = array<i64: 8, 512>}]} {
    %c0 = arith.constant 0 : index
    %c0_0 = arith.constant 0 : index
    %0 = vector.load %arg1[%c0, %c0_0] : memref<8x147xbf16, #tpu.memory_space<vmem>>, vector<8x147xbf16>
    %c0_1 = arith.constant 0 : index
    %c0_2 = arith.constant 0 : index
    %1 = vector.load %arg2[%c0_1, %c0_2] : memref<147x512xbf16, #tpu.memory_space<vmem>>, vector<147x512xbf16>
    %cst = arith.constant dense<0.000000e+00> : vector<8x512xf32>
    %2 = tpu.matmul %0, %1, %cst {dimension_numbers = #tpu.dot_dimension_numbers<[1], [0], [0], [1], [0, 0, 1, 1], [], []>} : vector<8x147xbf16>, vector<147x512xbf16>, vector<8x512xf32> -> vector<8x512xf32>
    %c0_3 = arith.constant 0 : index
    %c0_4 = arith.constant 0 : index
    %3 = vector.load %arg3[%c0_3, %c0_4] : memref<8x1xf32, #tpu.memory_space<vmem>>, vector<8x1xf32>
    %4 = vector.broadcast %3 : vector<8x1xf32> to vector<8x512xf32>
    %5 = arith.addf %2, %4 : vector<8x512xf32>
    %cst_5 = arith.constant 0.000000e+00 : f32
    %6 = vector.broadcast %cst_5 : f32 to vector<8x512xf32>
    %7 = arith.maximumf %5, %6 : vector<8x512xf32>
    %c0_6 = arith.constant 0 : index
    %c0_7 = arith.constant 0 : index
    %8 = vector.load %arg4[%c0_6, %c0_7] : memref<8x512xf32, #tpu.memory_space<vmem>>, vector<8x512xf32>
    tpu.vector_store %arg4[%c0_6, %c0_7], %7 {strides = array<i32>} : memref<8x512xf32, #tpu.memory_space<vmem>>, vector<8x512xf32>,
    return
  }
  func.func @transform_0(%arg0: i32) -> (i32, i32) {
    %c0_i32 = arith.constant 0 : i32
    %c0_i32_0 = arith.constant 0 : i32
    %c0_i32_1 = arith.constant 0 : i32
    return %c0_i32, %c0_i32_0 : i32, i32
  }
  func.func @transform_1(%arg0: i32) -> (i32, i32) {
    %c0_i32 = arith.constant 0 : i32
    %c0_i32_0 = arith.constant 0 : i32
    return %c0_i32, %arg0 : i32, i32
  }
  func.func @transform_2(%arg0: i32) -> (i32, i32) {
    %c0_i32 = arith.constant 0 : i32
    %c0_i32_0 = arith.constant 0 : i32
    %c0_i32_1 = arith.constant 0 : i32
    return %c0_i32, %c0_i32_0 : i32, i32
  }
  func.func @transform_3(%arg0: i32) -> (i32, i32) {
    %c0_i32 = arith.constant 0 : i32
    %c0_i32_0 = arith.constant 0 : i32
    return %c0_i32, %arg0 : i32, i32
  }
}

module attributes {stable_mosaic.version = 11 : i64} {
  func.func @_gemm_bias_act_kernel(%arg0: i32, %arg1: memref<16x72xbf16, #tpu.memory_space<vmem>>, %arg2: memref<72x128xbf16, #tpu.memory_space<vmem>>, %arg3: memref<16x1xf32, #tpu.memory_space<vmem>>, %arg4: memref<16x128xf32, #tpu.memory_space<vmem>>) attributes {dimension_semantics = [#tpu.dimension_semantics<parallel>], iteration_bounds = array<i64: 1>, scalar_prefetch = 0 : i64, scratch_operands = 0 : i64, tpu.core_type = #tpu.core_type<tc>, window_params = [{pipeline_mode = #tpu.pipeline_mode<synchronous>, transform_indices = @transform_0, window_bounds = array<i64: 16, 72>}, {transform_indices = @transform_1, window_bounds = array<i64: 72, 128>}, {pipeline_mode = #tpu.pipeline_mode<synchronous>, transform_indices = @transform_2, window_bounds = array<i64: 16, 1>}, {transform_indices = @transform_3, window_bounds = array<i64: 16, 128>}]} {
    %c0 = arith.constant 0 : index
    %c0_0 = arith.constant 0 : index
    %0 = vector.load %arg1[%c0, %c0_0] : memref<16x72xbf16, #tpu.memory_space<vmem>>, vector<16x72xbf16>
    %c0_1 = arith.constant 0 : index
    %c0_2 = arith.constant 0 : index
    %1 = vector.load %arg2[%c0_1, %c0_2] : memref<72x128xbf16, #tpu.memory_space<vmem>>, vector<72x128xbf16>
    %cst = arith.constant dense<0.000000e+00> : vector<16x128xf32>
    %2 = tpu.matmul %0, %1, %cst {dimension_numbers = #tpu.dot_dimension_numbers<[1], [0], [0], [1], [0, 0, 1, 1], [], []>} : vector<16x72xbf16>, vector<72x128xbf16>, vector<16x128xf32> -> vector<16x128xf32>
    %c0_3 = arith.constant 0 : index
    %c0_4 = arith.constant 0 : index
    %3 = vector.load %arg3[%c0_3, %c0_4] : memref<16x1xf32, #tpu.memory_space<vmem>>, vector<16x1xf32>
    %4 = vector.broadcast %3 : vector<16x1xf32> to vector<16x128xf32>
    %5 = arith.addf %2, %4 : vector<16x128xf32>
    %cst_5 = arith.constant 0.000000e+00 : f32
    %6 = vector.broadcast %cst_5 : f32 to vector<16x128xf32>
    %7 = arith.maximumf %5, %6 : vector<16x128xf32>
    %c0_6 = arith.constant 0 : index
    %c0_7 = arith.constant 0 : index
    %8 = vector.load %arg4[%c0_6, %c0_7] : memref<16x128xf32, #tpu.memory_space<vmem>>, vector<16x128xf32>
    tpu.vector_store %arg4[%c0_6, %c0_7], %7 {strides = array<i32>} : memref<16x128xf32, #tpu.memory_space<vmem>>, vector<16x128xf32>,
    return
  }
  func.func @transform_0(%arg0: i32) -> (i32, i32) {
    %c0_i32 = arith.constant 0 : i32
    %c0_i32_0 = arith.constant 0 : i32
    %c0_i32_1 = arith.constant 0 : i32
    return %c0_i32, %c0_i32_0 : i32, i32
  }
  func.func @transform_1(%arg0: i32) -> (i32, i32) {
    %c0_i32 = arith.constant 0 : i32
    %c0_i32_0 = arith.constant 0 : i32
    return %c0_i32, %arg0 : i32, i32
  }
  func.func @transform_2(%arg0: i32) -> (i32, i32) {
    %c0_i32 = arith.constant 0 : i32
    %c0_i32_0 = arith.constant 0 : i32
    %c0_i32_1 = arith.constant 0 : i32
    return %c0_i32, %c0_i32_0 : i32, i32
  }
  func.func @transform_3(%arg0: i32) -> (i32, i32) {
    %c0_i32 = arith.constant 0 : i32
    %c0_i32_0 = arith.constant 0 : i32
    return %c0_i32, %arg0 : i32, i32
  }
}

module attributes {stable_mosaic.version = 11 : i64} {
  func.func @_gemm_bias_act_kernel(%arg0: i32, %arg1: memref<32x144xbf16, #tpu.memory_space<vmem>>, %arg2: memref<144x128xbf16, #tpu.memory_space<vmem>>, %arg3: memref<32x1xf32, #tpu.memory_space<vmem>>, %arg4: memref<32x128xf32, #tpu.memory_space<vmem>>) attributes {dimension_semantics = [#tpu.dimension_semantics<parallel>], iteration_bounds = array<i64: 1>, scalar_prefetch = 0 : i64, scratch_operands = 0 : i64, tpu.core_type = #tpu.core_type<tc>, window_params = [{pipeline_mode = #tpu.pipeline_mode<synchronous>, transform_indices = @transform_0, window_bounds = array<i64: 32, 144>}, {transform_indices = @transform_1, window_bounds = array<i64: 144, 128>}, {pipeline_mode = #tpu.pipeline_mode<synchronous>, transform_indices = @transform_2, window_bounds = array<i64: 32, 1>}, {transform_indices = @transform_3, window_bounds = array<i64: 32, 128>}]} {
    %c0 = arith.constant 0 : index
    %c0_0 = arith.constant 0 : index
    %0 = vector.load %arg1[%c0, %c0_0] : memref<32x144xbf16, #tpu.memory_space<vmem>>, vector<32x144xbf16>
    %c0_1 = arith.constant 0 : index
    %c0_2 = arith.constant 0 : index
    %1 = vector.load %arg2[%c0_1, %c0_2] : memref<144x128xbf16, #tpu.memory_space<vmem>>, vector<144x128xbf16>
    %cst = arith.constant dense<0.000000e+00> : vector<32x128xf32>
    %2 = tpu.matmul %0, %1, %cst {dimension_numbers = #tpu.dot_dimension_numbers<[1], [0], [0], [1], [0, 0, 1, 1], [], []>} : vector<32x144xbf16>, vector<144x128xbf16>, vector<32x128xf32> -> vector<32x128xf32>
    %c0_3 = arith.constant 0 : index
    %c0_4 = arith.constant 0 : index
    %3 = vector.load %arg3[%c0_3, %c0_4] : memref<32x1xf32, #tpu.memory_space<vmem>>, vector<32x1xf32>
    %4 = vector.broadcast %3 : vector<32x1xf32> to vector<32x128xf32>
    %5 = arith.addf %2, %4 : vector<32x128xf32>
    %cst_5 = arith.constant 0.000000e+00 : f32
    %6 = vector.broadcast %cst_5 : f32 to vector<32x128xf32>
    %7 = arith.maximumf %5, %6 : vector<32x128xf32>
    %c0_6 = arith.constant 0 : index
    %c0_7 = arith.constant 0 : index
    %8 = vector.load %arg4[%c0_6, %c0_7] : memref<32x128xf32, #tpu.memory_space<vmem>>, vector<32x128xf32>
    tpu.vector_store %arg4[%c0_6, %c0_7], %7 {strides = array<i32>} : memref<32x128xf32, #tpu.memory_space<vmem>>, vector<32x128xf32>,
    return
  }
  func.func @transform_0(%arg0: i32) -> (i32, i32) {
    %c0_i32 = arith.constant 0 : i32
    %c0_i32_0 = arith.constant 0 : i32
    %c0_i32_1 = arith.constant 0 : i32
    return %c0_i32, %c0_i32_0 : i32, i32
  }
  func.func @transform_1(%arg0: i32) -> (i32, i32) {
    %c0_i32 = arith.constant 0 : i32
    %c0_i32_0 = arith.constant 0 : i32
    return %c0_i32, %arg0 : i32, i32
  }
  func.func @transform_2(%arg0: i32) -> (i32, i32) {
    %c0_i32 = arith.constant 0 : i32
    %c0_i32_0 = arith.constant 0 : i32
    %c0_i32_1 = arith.constant 0 : i32
    return %c0_i32, %c0_i32_0 : i32, i32
  }
  func.func @transform_3(%arg0: i32) -> (i32, i32) {
    %c0_i32 = arith.constant 0 : i32
    %c0_i32_0 = arith.constant 0 : i32
    return %c0_i32, %arg0 : i32, i32
  }
}

module attributes {stable_mosaic.version = 11 : i64} {
  func.func @_gemm_bias_act_kernel(%arg0: i32, %arg1: memref<32x288xbf16, #tpu.memory_space<vmem>>, %arg2: memref<288x128xbf16, #tpu.memory_space<vmem>>, %arg3: memref<32x1xf32, #tpu.memory_space<vmem>>, %arg4: memref<32x128xf32, #tpu.memory_space<vmem>>) attributes {dimension_semantics = [#tpu.dimension_semantics<parallel>], iteration_bounds = array<i64: 1>, scalar_prefetch = 0 : i64, scratch_operands = 0 : i64, tpu.core_type = #tpu.core_type<tc>, window_params = [{pipeline_mode = #tpu.pipeline_mode<synchronous>, transform_indices = @transform_0, window_bounds = array<i64: 32, 288>}, {transform_indices = @transform_1, window_bounds = array<i64: 288, 128>}, {pipeline_mode = #tpu.pipeline_mode<synchronous>, transform_indices = @transform_2, window_bounds = array<i64: 32, 1>}, {transform_indices = @transform_3, window_bounds = array<i64: 32, 128>}]} {
    %c0 = arith.constant 0 : index
    %c0_0 = arith.constant 0 : index
    %0 = vector.load %arg1[%c0, %c0_0] : memref<32x288xbf16, #tpu.memory_space<vmem>>, vector<32x288xbf16>
    %c0_1 = arith.constant 0 : index
    %c0_2 = arith.constant 0 : index
    %1 = vector.load %arg2[%c0_1, %c0_2] : memref<288x128xbf16, #tpu.memory_space<vmem>>, vector<288x128xbf16>
    %cst = arith.constant dense<0.000000e+00> : vector<32x128xf32>
    %2 = tpu.matmul %0, %1, %cst {dimension_numbers = #tpu.dot_dimension_numbers<[1], [0], [0], [1], [0, 0, 1, 1], [], []>} : vector<32x288xbf16>, vector<288x128xbf16>, vector<32x128xf32> -> vector<32x128xf32>
    %c0_3 = arith.constant 0 : index
    %c0_4 = arith.constant 0 : index
    %3 = vector.load %arg3[%c0_3, %c0_4] : memref<32x1xf32, #tpu.memory_space<vmem>>, vector<32x1xf32>
    %4 = vector.broadcast %3 : vector<32x1xf32> to vector<32x128xf32>
    %5 = arith.addf %2, %4 : vector<32x128xf32>
    %cst_5 = arith.constant 0.000000e+00 : f32
    %6 = vector.broadcast %cst_5 : f32 to vector<32x128xf32>
    %7 = arith.maximumf %5, %6 : vector<32x128xf32>
    %c0_6 = arith.constant 0 : index
    %c0_7 = arith.constant 0 : index
    %8 = vector.load %arg4[%c0_6, %c0_7] : memref<32x128xf32, #tpu.memory_space<vmem>>, vector<32x128xf32>
    tpu.vector_store %arg4[%c0_6, %c0_7], %7 {strides = array<i32>} : memref<32x128xf32, #tpu.memory_space<vmem>>, vector<32x128xf32>,
    return
  }
  func.func @transform_0(%arg0: i32) -> (i32, i32) {
    %c0_i32 = arith.constant 0 : i32
    %c0_i32_0 = arith.constant 0 : i32
    %c0_i32_1 = arith.constant 0 : i32
    return %c0_i32, %c0_i32_0 : i32, i32
  }
  func.func @transform_1(%arg0: i32) -> (i32, i32) {
    %c0_i32 = arith.constant 0 : i32
    %c0_i32_0 = arith.constant 0 : i32
    return %c0_i32, %arg0 : i32, i32
  }
  func.func @transform_2(%arg0: i32) -> (i32, i32) {
    %c0_i32 = arith.constant 0 : i32
    %c0_i32_0 = arith.constant 0 : i32
    %c0_i32_1 = arith.constant 0 : i32
    return %c0_i32, %c0_i32_0 : i32, i32
  }
  func.func @transform_3(%arg0: i32) -> (i32, i32) {
    %c0_i32 = arith.constant 0 : i32
    %c0_i32_0 = arith.constant 0 : i32
    return %c0_i32, %arg0 : i32, i32
  }
}

module attributes {stable_mosaic.version = 11 : i64} {
  func.func @_gemm_bias_act_kernel(%arg0: i32, %arg1: memref<32x288xbf16, #tpu.memory_space<vmem>>, %arg2: memref<288x128xbf16, #tpu.memory_space<vmem>>, %arg3: memref<32x1xf32, #tpu.memory_space<vmem>>, %arg4: memref<32x128xf32, #tpu.memory_space<vmem>>, %arg5: memref<128x2xf32, #tpu.memory_space<vmem>>, %arg6: memref<32x128xf32, #tpu.memory_space<vmem>>, %arg7: memref<32x2xf32, #tpu.memory_space<vmem>>) attributes {dimension_semantics = [#tpu.dimension_semantics<arbitrary>], iteration_bounds = array<i64: 1>, scalar_prefetch = 0 : i64, scratch_operands = 0 : i64, tpu.core_type = #tpu.core_type<tc>, window_params = [{pipeline_mode = #tpu.pipeline_mode<synchronous>, transform_indices = @transform_0, window_bounds = array<i64: 32, 288>}, {transform_indices = @transform_1, window_bounds = array<i64: 288, 128>}, {pipeline_mode = #tpu.pipeline_mode<synchronous>, transform_indices = @transform_2, window_bounds = array<i64: 32, 1>}, {transform_indices = @transform_3, window_bounds = array<i64: 32, 128>}, {transform_indices = @transform_4, window_bounds = array<i64: 128, 2>}, {transform_indices = @transform_5, window_bounds = array<i64: 32, 128>}, {pipeline_mode = #tpu.pipeline_mode<synchronous>, transform_indices = @transform_6, window_bounds = array<i64: 32, 2>}]} {
    %c0 = arith.constant 0 : index
    %c0_0 = arith.constant 0 : index
    %0 = vector.load %arg1[%c0, %c0_0] : memref<32x288xbf16, #tpu.memory_space<vmem>>, vector<32x288xbf16>
    %c0_1 = arith.constant 0 : index
    %c0_2 = arith.constant 0 : index
    %1 = vector.load %arg2[%c0_1, %c0_2] : memref<288x128xbf16, #tpu.memory_space<vmem>>, vector<288x128xbf16>
    %cst = arith.constant dense<0.000000e+00> : vector<32x128xf32>
    %2 = tpu.matmul %0, %1, %cst {dimension_numbers = #tpu.dot_dimension_numbers<[1], [0], [0], [1], [0, 0, 1, 1], [], []>} : vector<32x288xbf16>, vector<288x128xbf16>, vector<32x128xf32> -> vector<32x128xf32>
    %c0_3 = arith.constant 0 : index
    %c0_4 = arith.constant 0 : index
    %3 = vector.load %arg3[%c0_3, %c0_4] : memref<32x1xf32, #tpu.memory_space<vmem>>, vector<32x1xf32>
    %4 = vector.broadcast %3 : vector<32x1xf32> to vector<32x128xf32>
    %5 = arith.addf %2, %4 : vector<32x128xf32>
    %c0_5 = arith.constant 0 : index
    %c0_6 = arith.constant 0 : index
    %6 = vector.load %arg4[%c0_5, %c0_6] : memref<32x128xf32, #tpu.memory_space<vmem>>, vector<32x128xf32>
    %7 = arith.addf %5, %6 : vector<32x128xf32>
    %c0_7 = arith.constant 0 : index
    %c0_8 = arith.constant 0 : index
    %8 = vector.load %arg6[%c0_7, %c0_8] : memref<32x128xf32, #tpu.memory_space<vmem>>, vector<32x128xf32>
    tpu.vector_store %arg6[%c0_7, %c0_8], %7 {strides = array<i32>} : memref<32x128xf32, #tpu.memory_space<vmem>>, vector<32x128xf32>,
    %c0_i32 = arith.constant 0 : i32
    %9 = arith.cmpi eq, %arg0, %c0_i32 : i32
    %10 = arith.extui %9 : i1 to i32
    %c0_i32_9 = arith.constant 0 : i32
    %11 = arith.cmpi ne, %10, %c0_i32_9 : i32
    scf.if %11 {
      %cst_17 = arith.constant 0.000000e+00 : f32
      %17 = vector.broadcast %cst_17 : f32 to vector<32x2xf32>
      %c0_18 = arith.constant 0 : index
      %c0_19 = arith.constant 0 : index
      %18 = vector.load %arg7[%c0_18, %c0_19] : memref<32x2xf32, #tpu.memory_space<vmem>>, vector<32x2xf32>
      tpu.vector_store %arg7[%c0_18, %c0_19], %17 {strides = array<i32>} : memref<32x2xf32, #tpu.memory_space<vmem>>, vector<32x2xf32>,
    } else {
    }
    %c0_10 = arith.constant 0 : index
    %c0_11 = arith.constant 0 : index
    %12 = vector.load %arg7[%c0_10, %c0_11] : memref<32x2xf32, #tpu.memory_space<vmem>>, vector<32x2xf32>
    %c0_12 = arith.constant 0 : index
    %c0_13 = arith.constant 0 : index
    %13 = vector.load %arg5[%c0_12, %c0_13] : memref<128x2xf32, #tpu.memory_space<vmem>>, vector<128x2xf32>
    %cst_14 = arith.constant dense<0.000000e+00> : vector<32x2xf32>
    %14 = tpu.matmul %7, %13, %cst_14 {dimension_numbers = #tpu.dot_dimension_numbers<[1], [0], [0], [1], [0, 0, 1, 1], [], []>} : vector<32x128xf32>, vector<128x2xf32>, vector<32x2xf32> -> vector<32x2xf32>
    %15 = arith.addf %12, %14 : vector<32x2xf32>
    %c0_15 = arith.constant 0 : index
    %c0_16 = arith.constant 0 : index
    %16 = vector.load %arg7[%c0_15, %c0_16] : memref<32x2xf32, #tpu.memory_space<vmem>>, vector<32x2xf32>
    tpu.vector_store %arg7[%c0_15, %c0_16], %15 {strides = array<i32>} : memref<32x2xf32, #tpu.memory_space<vmem>>, vector<32x2xf32>,
    return
  }
  func.func @transform_0(%arg0: i32) -> (i32, i32) {
    %c0_i32 = arith.constant 0 : i32
    %c0_i32_0 = arith.constant 0 : i32
    %c0_i32_1 = arith.constant 0 : i32
    return %c0_i32, %c0_i32_0 : i32, i32
  }
  func.func @transform_1(%arg0: i32) -> (i32, i32) {
    %c0_i32 = arith.constant 0 : i32
    %c0_i32_0 = arith.constant 0 : i32
    return %c0_i32, %arg0 : i32, i32
  }
  func.func @transform_2(%arg0: i32) -> (i32, i32) {
    %c0_i32 = arith.constant 0 : i32
    %c0_i32_0 = arith.constant 0 : i32
    %c0_i32_1 = arith.constant 0 : i32
    return %c0_i32, %c0_i32_0 : i32, i32
  }
  func.func @transform_3(%arg0: i32) -> (i32, i32) {
    %c0_i32 = arith.constant 0 : i32
    %c0_i32_0 = arith.constant 0 : i32
    return %c0_i32, %arg0 : i32, i32
  }
  func.func @transform_4(%arg0: i32) -> (i32, i32) {
    %c0_i32 = arith.constant 0 : i32
    %c0_i32_0 = arith.constant 0 : i32
    return %arg0, %c0_i32 : i32, i32
  }
  func.func @transform_5(%arg0: i32) -> (i32, i32) {
    %c0_i32 = arith.constant 0 : i32
    %c0_i32_0 = arith.constant 0 : i32
    return %c0_i32, %arg0 : i32, i32
  }
  func.func @transform_6(%arg0: i32) -> (i32, i32) {
    %c0_i32 = arith.constant 0 : i32
    %c0_i32_0 = arith.constant 0 : i32
    %c0_i32_1 = arith.constant 0 : i32
    return %c0_i32, %c0_i32_0 : i32, i32
  }
}

module attributes {stable_mosaic.version = 11 : i64} {
  func.func @_modulate_kernel(%arg0: i32, %arg1: memref<32x2x16xf32, #tpu.memory_space<vmem>>, %arg2: memref<32x2xf32, #tpu.memory_space<vmem>>, %arg3: memref<32x32xf32, #tpu.memory_space<vmem>>, %arg4: memref<32x2xf32, #tpu.memory_space<vmem>>, %arg5: memref<32x32xf32, #tpu.memory_space<vmem>>, %arg6: memref<32x1xf32, #tpu.memory_space<vmem>>, %arg7: memref<32x32xf32, #tpu.memory_space<vmem>>, %arg8: memref<32x2xf32, #tpu.memory_space<vmem>>, %arg9: memref<32x32xf32, #tpu.memory_space<vmem>>, %arg10: memref<32x1xf32, #tpu.memory_space<vmem>>, %arg11: memref<32x2x16xf32, #tpu.memory_space<vmem>>, %arg12: memref<32x2xf32, #tpu.memory_space<vmem>>, %arg13: memref<32x2xf32, #tpu.memory_space<vmem>>) attributes {dimension_semantics = [#tpu.dimension_semantics<arbitrary>], iteration_bounds = array<i64: 1>, scalar_prefetch = 0 : i64, scratch_operands = 2 : i64, tpu.core_type = #tpu.core_type<tc>, window_params = [{transform_indices = @transform_0, window_bounds = array<i64: 32, 2, 16>}, {pipeline_mode = #tpu.pipeline_mode<synchronous>, transform_indices = @transform_1, window_bounds = array<i64: 32, 2>}, {pipeline_mode = #tpu.pipeline_mode<synchronous>, transform_indices = @transform_2, window_bounds = array<i64: 32, 32>}, {pipeline_mode = #tpu.pipeline_mode<synchronous>, transform_indices = @transform_3, window_bounds = array<i64: 32, 2>}, {pipeline_mode = #tpu.pipeline_mode<synchronous>, transform_indices = @transform_4, window_bounds = array<i64: 32, 32>}, {pipeline_mode = #tpu.pipeline_mode<synchronous>, transform_indices = @transform_5, window_bounds = array<i64: 32, 1>}, {pipeline_mode = #tpu.pipeline_mode<synchronous>, transform_indices = @transform_6, window_bounds = array<i64: 32, 32>}, {pipeline_mode = #tpu.pipeline_mode<synchronous>, transform_indices = @transform_7, window_bounds = array<i64: 32, 2>}, {pipeline_mode = #tpu.pipeline_mode<synchronous>, transform_indices = @transform_8, window_bounds = array<i64: 32, 32>}, {pipeline_mode = #tpu.pipeline_mode<synchronous>, transform_indices = @transform_9, window_bounds = array<i64: 32, 1>}, {transform_indices = @transform_10, window_bounds = array<i64: 32, 2, 16>}]} {
    %c0_i32 = arith.constant 0 : i32
    %0 = arith.cmpi eq, %arg0, %c0_i32 : i32
    %1 = arith.extui %0 : i1 to i32
    %c0_i32_0 = arith.constant 0 : i32
    %2 = arith.cmpi ne, %1, %c0_i32_0 : i32
    scf.if %2 {
      %c0_10 = arith.constant 0 : index
      %c0_11 = arith.constant 0 : index
      %13 = vector.load %arg2[%c0_10, %c0_11] : memref<32x2xf32, #tpu.memory_space<vmem>>, vector<32x2xf32>
      %cst = arith.constant 6.250000e-02 : f32
      %14 = vector.broadcast %cst : f32 to vector<32x2xf32>
      %15 = arith.mulf %13, %14 : vector<32x2xf32>
      %c0_12 = arith.constant 0 : index
      %c0_13 = arith.constant 0 : index
      %16 = vector.load %arg3[%c0_12, %c0_13] : memref<32x32xf32, #tpu.memory_space<vmem>>, vector<32x32xf32>
      %cst_14 = arith.constant dense<0.000000e+00> : vector<32x2xf32>
      %17 = tpu.matmul %16, %15, %cst_14 {dimension_numbers = #tpu.dot_dimension_numbers<[1], [0], [0], [1], [0, 0, 1, 1], [], []>} : vector<32x32xf32>, vector<32x2xf32>, vector<32x2xf32> -> vector<32x2xf32>
      %c0_15 = arith.constant 0 : index
      %c0_16 = arith.constant 0 : index
      %18 = vector.load %arg4[%c0_15, %c0_16] : memref<32x2xf32, #tpu.memory_space<vmem>>, vector<32x2xf32>
      %19 = arith.addf %17, %18 : vector<32x2xf32>
      %cst_17 = arith.constant 0.000000e+00 : f32
      %20 = vector.broadcast %cst_17 : f32 to vector<32x2xf32>
      %21 = arith.maximumf %19, %20 : vector<32x2xf32>
      %c0_18 = arith.constant 0 : index
      %c0_19 = arith.constant 0 : index
      %22 = vector.load %arg5[%c0_18, %c0_19] : memref<32x32xf32, #tpu.memory_space<vmem>>, vector<32x32xf32>
      %cst_20 = arith.constant dense<0.000000e+00> : vector<32x2xf32>
      %23 = tpu.matmul %22, %21, %cst_20 {dimension_numbers = #tpu.dot_dimension_numbers<[1], [0], [0], [1], [0, 0, 1, 1], [], []>} : vector<32x32xf32>, vector<32x2xf32>, vector<32x2xf32> -> vector<32x2xf32>
      %c0_21 = arith.constant 0 : index
      %c0_22 = arith.constant 0 : index
      %24 = vector.load %arg6[%c0_21, %c0_22] : memref<32x1xf32, #tpu.memory_space<vmem>>, vector<32x1xf32>
      %25 = vector.broadcast %24 : vector<32x1xf32> to vector<32x2xf32>
      %26 = arith.addf %23, %25 : vector<32x2xf32>
      %27 = arith.negf %26 : vector<32x2xf32>
      %28 = math.exp %27 : vector<32x2xf32>
      %cst_23 = arith.constant 1.000000e+00 : f32
      %29 = vector.broadcast %cst_23 : f32 to vector<32x2xf32>
      %30 = arith.addf %29, %28 : vector<32x2xf32>
      %31 = arith.divf %29, %30 : vector<32x2xf32>
      %c0_24 = arith.constant 0 : index
      %c0_25 = arith.constant 0 : index
      %32 = vector.load %arg12[%c0_24, %c0_25] : memref<32x2xf32, #tpu.memory_space<vmem>>, vector<32x2xf32>
      tpu.vector_store %arg12[%c0_24, %c0_25], %31 {strides = array<i32>} : memref<32x2xf32, #tpu.memory_space<vmem>>, vector<32x2xf32>,
      %c0_26 = arith.constant 0 : index
      %c0_27 = arith.constant 0 : index
      %33 = vector.load %arg7[%c0_26, %c0_27] : memref<32x32xf32, #tpu.memory_space<vmem>>, vector<32x32xf32>
      %cst_28 = arith.constant dense<0.000000e+00> : vector<32x2xf32>
      %34 = tpu.matmul %33, %15, %cst_28 {dimension_numbers = #tpu.dot_dimension_numbers<[1], [0], [0], [1], [0, 0, 1, 1], [], []>} : vector<32x32xf32>, vector<32x2xf32>, vector<32x2xf32> -> vector<32x2xf32>
      %c0_29 = arith.constant 0 : index
      %c0_30 = arith.constant 0 : index
      %35 = vector.load %arg8[%c0_29, %c0_30] : memref<32x2xf32, #tpu.memory_space<vmem>>, vector<32x2xf32>
      %36 = arith.addf %34, %35 : vector<32x2xf32>
      %cst_31 = arith.constant 0.000000e+00 : f32
      %37 = vector.broadcast %cst_31 : f32 to vector<32x2xf32>
      %38 = arith.maximumf %36, %37 : vector<32x2xf32>
      %c0_32 = arith.constant 0 : index
      %c0_33 = arith.constant 0 : index
      %39 = vector.load %arg9[%c0_32, %c0_33] : memref<32x32xf32, #tpu.memory_space<vmem>>, vector<32x32xf32>
      %cst_34 = arith.constant dense<0.000000e+00> : vector<32x2xf32>
      %40 = tpu.matmul %39, %38, %cst_34 {dimension_numbers = #tpu.dot_dimension_numbers<[1], [0], [0], [1], [0, 0, 1, 1], [], []>} : vector<32x32xf32>, vector<32x2xf32>, vector<32x2xf32> -> vector<32x2xf32>
      %c0_35 = arith.constant 0 : index
      %c0_36 = arith.constant 0 : index
      %41 = vector.load %arg10[%c0_35, %c0_36] : memref<32x1xf32, #tpu.memory_space<vmem>>, vector<32x1xf32>
      %42 = vector.broadcast %41 : vector<32x1xf32> to vector<32x2xf32>
      %43 = arith.addf %40, %42 : vector<32x2xf32>
      %c0_37 = arith.constant 0 : index
      %c0_38 = arith.constant 0 : index
      %44 = vector.load %arg13[%c0_37, %c0_38] : memref<32x2xf32, #tpu.memory_space<vmem>>, vector<32x2xf32>
      tpu.vector_store %arg13[%c0_37, %c0_38], %43 {strides = array<i32>} : memref<32x2xf32, #tpu.memory_space<vmem>>, vector<32x2xf32>,
    } else {
    }
    %c0 = arith.constant 0 : index
    %c0_1 = arith.constant 0 : index
    %3 = vector.load %arg12[%c0, %c0_1] : memref<32x2xf32, #tpu.memory_space<vmem>>, vector<32x2xf32>
    %c0_2 = arith.constant 0 : index
    %c0_3 = arith.constant 0 : index
    %4 = vector.load %arg13[%c0_2, %c0_3] : memref<32x2xf32, #tpu.memory_space<vmem>>, vector<32x2xf32>
    %c0_4 = arith.constant 0 : index
    %c0_5 = arith.constant 0 : index
    %c0_6 = arith.constant 0 : index
    %5 = vector.load %arg1[%c0_4, %c0_5, %c0_6] : memref<32x2x16xf32, #tpu.memory_space<vmem>>, vector<32x2x16xf32>
    %6 = vector.shape_cast %3 : vector<32x2xf32> to vector<32x2x1xf32>
    %7 = vector.broadcast %6 : vector<32x2x1xf32> to vector<32x2x16xf32>
    %8 = arith.mulf %5, %7 : vector<32x2x16xf32>
    %9 = vector.shape_cast %4 : vector<32x2xf32> to vector<32x2x1xf32>
    %10 = vector.broadcast %9 : vector<32x2x1xf32> to vector<32x2x16xf32>
    %11 = arith.addf %8, %10 : vector<32x2x16xf32>
    %c0_7 = arith.constant 0 : index
    %c0_8 = arith.constant 0 : index
    %c0_9 = arith.constant 0 : index
    %12 = vector.load %arg11[%c0_7, %c0_8, %c0_9] : memref<32x2x16xf32, #tpu.memory_space<vmem>>, vector<32x2x16xf32>
    tpu.vector_store %arg11[%c0_7, %c0_8, %c0_9], %11 {strides = array<i32>} : memref<32x2x16xf32, #tpu.memory_space<vmem>>, vector<32x2x16xf32>,
    return
  }
  func.func @transform_0(%arg0: i32) -> (i32, i32, i32) {
    %c0_i32 = arith.constant 0 : i32
    %c0_i32_0 = arith.constant 0 : i32
    %c0_i32_1 = arith.constant 0 : i32
    return %c0_i32, %c0_i32_0, %arg0 : i32, i32, i32
  }
  func.func @transform_1(%arg0: i32) -> (i32, i32) {
    %c0_i32 = arith.constant 0 : i32
    %c0_i32_0 = arith.constant 0 : i32
    %c0_i32_1 = arith.constant 0 : i32
    return %c0_i32, %c0_i32_0 : i32, i32
  }
  func.func @transform_2(%arg0: i32) -> (i32, i32) {
    %c0_i32 = arith.constant 0 : i32
    %c0_i32_0 = arith.constant 0 : i32
    %c0_i32_1 = arith.constant 0 : i32
    return %c0_i32, %c0_i32_0 : i32, i32
  }
  func.func @transform_3(%arg0: i32) -> (i32, i32) {
    %c0_i32 = arith.constant 0 : i32
    %c0_i32_0 = arith.constant 0 : i32
    %c0_i32_1 = arith.constant 0 : i32
    return %c0_i32, %c0_i32_0 : i32, i32
  }
  func.func @transform_4(%arg0: i32) -> (i32, i32) {
    %c0_i32 = arith.constant 0 : i32
    %c0_i32_0 = arith.constant 0 : i32
    %c0_i32_1 = arith.constant 0 : i32
    return %c0_i32, %c0_i32_0 : i32, i32
  }
  func.func @transform_5(%arg0: i32) -> (i32, i32) {
    %c0_i32 = arith.constant 0 : i32
    %c0_i32_0 = arith.constant 0 : i32
    %c0_i32_1 = arith.constant 0 : i32
    return %c0_i32, %c0_i32_0 : i32, i32
  }
  func.func @transform_6(%arg0: i32) -> (i32, i32) {
    %c0_i32 = arith.constant 0 : i32
    %c0_i32_0 = arith.constant 0 : i32
    %c0_i32_1 = arith.constant 0 : i32
    return %c0_i32, %c0_i32_0 : i32, i32
  }
  func.func @transform_7(%arg0: i32) -> (i32, i32) {
    %c0_i32 = arith.constant 0 : i32
    %c0_i32_0 = arith.constant 0 : i32
    %c0_i32_1 = arith.constant 0 : i32
    return %c0_i32, %c0_i32_0 : i32, i32
  }
  func.func @transform_8(%arg0: i32) -> (i32, i32) {
    %c0_i32 = arith.constant 0 : i32
    %c0_i32_0 = arith.constant 0 : i32
    %c0_i32_1 = arith.constant 0 : i32
    return %c0_i32, %c0_i32_0 : i32, i32
  }
  func.func @transform_9(%arg0: i32) -> (i32, i32) {
    %c0_i32 = arith.constant 0 : i32
    %c0_i32_0 = arith.constant 0 : i32
    %c0_i32_1 = arith.constant 0 : i32
    return %c0_i32, %c0_i32_0 : i32, i32
  }
  func.func @transform_10(%arg0: i32) -> (i32, i32, i32) {
    %c0_i32 = arith.constant 0 : i32
    %c0_i32_0 = arith.constant 0 : i32
    %c0_i32_1 = arith.constant 0 : i32
    return %c0_i32, %c0_i32_0, %arg0 : i32, i32, i32
  }
}

module attributes {stable_mosaic.version = 11 : i64} {
  func.func @_gemm_bias_act_kernel(%arg0: i32, %arg1: memref<4x288xbf16, #tpu.memory_space<vmem>>, %arg2: memref<288x128xbf16, #tpu.memory_space<vmem>>, %arg3: memref<4x1xf32, #tpu.memory_space<vmem>>, %arg4: memref<4x128xf32, #tpu.memory_space<vmem>>) attributes {dimension_semantics = [#tpu.dimension_semantics<parallel>], iteration_bounds = array<i64: 1>, scalar_prefetch = 0 : i64, scratch_operands = 0 : i64, tpu.core_type = #tpu.core_type<tc>, window_params = [{pipeline_mode = #tpu.pipeline_mode<synchronous>, transform_indices = @transform_0, window_bounds = array<i64: 4, 288>}, {transform_indices = @transform_1, window_bounds = array<i64: 288, 128>}, {pipeline_mode = #tpu.pipeline_mode<synchronous>, transform_indices = @transform_2, window_bounds = array<i64: 4, 1>}, {transform_indices = @transform_3, window_bounds = array<i64: 4, 128>}]} {
    %c0 = arith.constant 0 : index
    %c0_0 = arith.constant 0 : index
    %0 = vector.load %arg1[%c0, %c0_0] : memref<4x288xbf16, #tpu.memory_space<vmem>>, vector<4x288xbf16>
    %c0_1 = arith.constant 0 : index
    %c0_2 = arith.constant 0 : index
    %1 = vector.load %arg2[%c0_1, %c0_2] : memref<288x128xbf16, #tpu.memory_space<vmem>>, vector<288x128xbf16>
    %cst = arith.constant dense<0.000000e+00> : vector<4x128xf32>
    %2 = tpu.matmul %0, %1, %cst {dimension_numbers = #tpu.dot_dimension_numbers<[1], [0], [0], [1], [0, 0, 1, 1], [], []>} : vector<4x288xbf16>, vector<288x128xbf16>, vector<4x128xf32> -> vector<4x128xf32>
    %c0_3 = arith.constant 0 : index
    %c0_4 = arith.constant 0 : index
    %3 = vector.load %arg3[%c0_3, %c0_4] : memref<4x1xf32, #tpu.memory_space<vmem>>, vector<4x1xf32>
    %4 = vector.broadcast %3 : vector<4x1xf32> to vector<4x128xf32>
    %5 = arith.addf %2, %4 : vector<4x128xf32>
    %c0_5 = arith.constant 0 : index
    %c0_6 = arith.constant 0 : index
    %6 = vector.load %arg4[%c0_5, %c0_6] : memref<4x128xf32, #tpu.memory_space<vmem>>, vector<4x128xf32>
    tpu.vector_store %arg4[%c0_5, %c0_6], %5 {strides = array<i32>} : memref<4x128xf32, #tpu.memory_space<vmem>>, vector<4x128xf32>,
    return
  }
  func.func @transform_0(%arg0: i32) -> (i32, i32) {
    %c0_i32 = arith.constant 0 : i32
    %c0_i32_0 = arith.constant 0 : i32
    %c0_i32_1 = arith.constant 0 : i32
    return %c0_i32, %c0_i32_0 : i32, i32
  }
  func.func @transform_1(%arg0: i32) -> (i32, i32) {
    %c0_i32 = arith.constant 0 : i32
    %c0_i32_0 = arith.constant 0 : i32
    return %c0_i32, %arg0 : i32, i32
  }
  func.func @transform_2(%arg0: i32) -> (i32, i32) {
    %c0_i32 = arith.constant 0 : i32
    %c0_i32_0 = arith.constant 0 : i32
    %c0_i32_1 = arith.constant 0 : i32
    return %c0_i32, %c0_i32_0 : i32, i32
  }
  func.func @transform_3(%arg0: i32) -> (i32, i32) {
    %c0_i32 = arith.constant 0 : i32
    %c0_i32_0 = arith.constant 0 : i32
    return %c0_i32, %arg0 : i32, i32
  }
}

</mosaic_0001>

<bundles_post_ra>
// kernel: jscc_encoder_forward.10
= control target key start
LH: loop header
LB: loop body
LE: loop exit
PB: predicated region body
PF: predicated region fallthrough
CT: control target
= control target key end

     0   :  { %v477_v2 = vmov 0   ;;  %vm260_vm0 = vcmask 1040384   ;;  %vm261_vm1 = vcmask 1041408   ;;  %v478_v36 = vmov 65535   ;;  %s632_s1 = inlined_call_operand.vmem [shape: bf16[147,512], index: 1, kind: input, shape index: {}]   ;;  %s633_s0 = inlined_call_operand.vmem [shape: bf16[8,147], index: 0, kind: input, shape index: {}]   ;;  %s634_s2 = inlined_call_operand.vmem [shape: f32[8,1], index: 2, kind: input, shape index: {}]   ;;  %s635_s3 = inlined_call_operand.vmem [shape: f32[8,512], index: 3, kind: output, shape index: {}]  }
   0x1   :  { %v417_v0 = vld [vmem:[%s632_s1 + $0x4] ss:$16 sps:$4 sm:$0xff]   ;;  %v419_v1 = vld [vmem:[%s632_s1 + $0xc] ss:$16 sps:$4 sm:$0xff]   ;;  %416 = vset.pattern.permute.xlu0 %v477_v2  ;;  %v421_v3 = vld [vmem:[%s632_s1] ss:$16 sps:$4 sm:$0xff]  }
   0x2   :  { %276 = vmatprep.subr.bf16.mxu0 %v417_v0  ;;  %v422_v4 = vld [vmem:[%s632_s1 + $0x8] ss:$16 sps:$4 sm:$0xff]   ;;  %317 = vmatprep.subr.bf16.mxu1 %v419_v1  ;;  %v423_v5 = vld [vmem:[%s632_s1 + $0x24] ss:$16 sps:$4 sm:$0xff]   ;;  %v425_v6 = vld [vmem:[%s632_s1 + $0x2c] ss:$16 sps:$4 sm:$0xff]  }
   0x3   :  { %277 = vmatpush1.bf16.msra.mxu0 %v421_v3  ;;  %318 = vmatpush1.bf16.msra.mxu1 %v422_v4  ;;  %v427_v7 = vld [vmem:[%s632_s1 + $0x20] ss:$16 sps:$4 sm:$0xff]   ;;  %v428_v8 = vld [vmem:[%s632_s1 + $0x28] ss:$16 sps:$4 sm:$0xff]   ;;  %v429_v9 = vld [vmem:[%s632_s1 + $0x44] ss:$16 sps:$4 sm:$0xff]  }
   0x4   :  { %278 = vmatprep.subr.bf16.mxu0 %v423_v5  ;;  %319 = vmatprep.subr.bf16.mxu1 %v425_v6  ;;  %v431_v10 = vld [vmem:[%s632_s1 + $0x4c] ss:$16 sps:$4 sm:$0xff]   ;;  %v433_v11 = vld [vmem:[%s632_s1 + $0x40] ss:$16 sps:$4 sm:$0xff]   ;;  %v434_v12 = vld [vmem:[%s632_s1 + $0x48] ss:$16 sps:$4 sm:$0xff]  }
   0x5   :  { %v435_v13 = vld [vmem:[%s632_s1 + $0x64] ss:$16 sps:$4 sm:$0xff]   ;;  %v437_v14 = vld [vmem:[%s632_s1 + $0x6c] ss:$16 sps:$4 sm:$0xff]   ;;  %v439_v15 = vld [vmem:[%s632_s1 + $0x60] ss:$16 sps:$4 sm:$0xff]  }
   0x6   :  { %v440_v16 = vld [vmem:[%s632_s1 + $0x68] ss:$16 sps:$4 sm:$0xff]   ;;  %v441_v17 = vld [vmem:[%s632_s1 + $0x84] ss:$16 sps:$4 sm:$0xff]   ;;  %v443_v18 = vld [vmem:[%s632_s1 + $0x8c] ss:$16 sps:$4 sm:$0xff]  }
   0x7   :  { %279 = vmatpush1.bf16.msra.mxu0 %v427_v7  ;;  %320 = vmatpush1.bf16.msra.mxu1 %v428_v8  ;;  %v445_v19 = vld [vmem:[%s632_s1 + $0x80] ss:$16 sps:$4 sm:$0xff]   ;;  %v446_v20 = vld [vmem:[%s632_s1 + $0x88] ss:$16 sps:$4 sm:$0xff]   ;;  %v447_v21 = vld [vmem:[%s632_s1 + $0xa4] ss:$16 sps:$4 sm:$0xff]  }
   0x8   :  { %280 = vmatprep.subr.bf16.mxu0 %v429_v9  ;;  %321 = vmatprep.subr.bf16.mxu1 %v431_v10  ;;  %v449_v22 = vld [vmem:[%s632_s1 + $0xac] ss:$16 sps:$4 sm:$0xff]   ;;  %v451_v23 = vld [vmem:[%s632_s1 + $0xa0] ss:$16 sps:$4 sm:$0xff]   ;;  %v452_v24 = vld [vmem:[%s632_s1 + $0xa8] ss:$16 sps:$4 sm:$0xff]  }
   0x9   :  { %v453_v25 = vld [vmem:[%s632_s1 + $0xc4] ss:$16 sps:$4 sm:$0xff]   ;;  %v455_v26 = vld [vmem:[%s632_s1 + $0xcc] ss:$16 sps:$4 sm:$0xff]   ;;  %v457_v27 = vld [vmem:[%s632_s1 + $0xc0] ss:$16 sps:$4 sm:$0xff]  }
   0xa   :  { %v458_v28 = vld [vmem:[%s632_s1 + $0xc8] ss:$16 sps:$4 sm:$0xff]   ;;  %v15_v29 = vld [vmem:[%s633_s0] sm:$0xff]  ;;  %v461_v31 = vld [vmem:[%s632_s1 + $0xec] ss:$16 sps:$4 sm:$0xff]   ;;  %v262_v37 = vsel %vm260_vm0, 4294967295, %v478_v36 }
   0xb   :  { %281 = vmatpush1.bf16.msra.mxu0 %v433_v11  ;;  %322 = vmatpush1.bf16.msra.mxu1 %v434_v12  ;;  %v459_v30 = vld [vmem:[%s632_s1 + $0xe4] ss:$16 sps:$4 sm:$0xff]   ;;  %v53_v34 = vld [vmem:[%s632_s1 + $0x128] sm:$0x33]  ;;  %v371_v35 = vcombine.high %v15_v29, %v15_v29  ;;  %vm256_vm2 = vcmask 154624   ;;  %v263_v44 = vsel %vm261_vm1, %v262_v37, 0  ;;  %v370_v53 = vcombine.low %v15_v29, %v15_v29 }
   0xc   :  { %282 = vmatprep.subr.bf16.mxu0 %v435_v13  ;;  %323 = vmatprep.subr.bf16.mxu1 %v437_v14  ;;  %v54_v32 = vld [vmem:[%s634_s2] sm:$0xff]  ;;  %v464_v39 = vld [vmem:[%s632_s1 + $0xe8] ss:$16 sps:$4 sm:$0xff]   ;;  %v467_v41 = vld [vmem:[%s632_s1 + $0x10c] ss:$16 sps:$4 sm:$0xff]   ;;  %v411_v43 = vcombine.high %v53_v34, %v53_v34  ;;  %v410_v48 = vcombine.low %v53_v34, %v53_v34 }
   0xd   :  { %v52_v33 = vld [vmem:[%s632_s1 + $0x120] sm:$0x33]  ;;  %57 = vperm.xlu0 %416, %v54_v32   ;;  %412 = vmatprep.mubr.msk.bf16.mxu0 %vm256_vm2, %v371_v35  ;;  %v470_v46 = vld [vmem:[%s632_s1 + $0x108] ss:$16 sps:$4 sm:$0xff]  }
   0xe   :  { %v463_v38 = vld [vmem:[%s632_s1 + $0xe0] ss:$16 sps:$4 sm:$0xff]   ;;  %v465_v40 = vld [vmem:[%s632_s1 + $0x104] ss:$16 sps:$4 sm:$0xff]   ;;  %v409_v42 = vcombine.high %v52_v33, %v52_v33  ;;  %413 = vmatprep.mubr.msk.bf16.mxu1 %vm256_vm2, %v371_v35  ;;  %v408_v47 = vcombine.low %v52_v33, %v52_v33  ;;  %v274_v50 = vand.u32 %v411_v43, %v263_v44  ;;  %v271_v52 = vand.u32 %v410_v48, %v263_v44 }
   0xf   :  { %283 = vmatpush1.bf16.msra.mxu0 %v439_v15  ;;  %324 = vmatpush1.bf16.msra.mxu1 %v440_v16  ;;  %v469_v45 = vld [vmem:[%s632_s1 + $0x100] ss:$16 sps:$4 sm:$0xff]  }
  0x10   :  { %284 = vmatprep.subr.bf16.mxu0 %v441_v17  ;;  %325 = vmatprep.subr.bf16.mxu1 %v443_v18  ;;  %v268_v49 = vand.u32 %v409_v42, %v263_v44  ;;  %v265_v51 = vand.u32 %v408_v47, %v263_v44 }
  0x13   :  { %285 = vmatpush1.bf16.msra.mxu0 %v445_v19  ;;  %326 = vmatpush1.bf16.msra.mxu1 %v446_v20 }
  0x14   :  { %286 = vmatprep.subr.bf16.mxu0 %v447_v21  ;;  %327 = vmatprep.subr.bf16.mxu1 %v449_v22 }
  0x17   :  { %287 = vmatpush1.bf16.msra.mxu0 %v451_v23  ;;  %328 = vmatpush1.bf16.msra.mxu1 %v452_v24 }
  0x18   :  { %288 = vmatprep.subr.bf16.mxu0 %v453_v25  ;;  %329 = vmatprep.subr.bf16.mxu1 %v455_v26 }
  0x1b   :  { %289 = vmatpush1.bf16.msra.mxu0 %v457_v27  ;;  %330 = vmatpush1.bf16.msra.mxu1 %v458_v28 }
  0x1c   :  { %290 = vmatprep.subr.bf16.mxu0 %v459_v30  ;;  %331 = vmatprep.subr.bf16.mxu1 %v461_v31 }
  0x1f   :  { %291 = vmatpush1.bf16.msra.mxu0 %v463_v38  ;;  %332 = vmatpush1.bf16.msra.mxu1 %v464_v39 }
  0x20   :  { %292 = vmatprep.subr.bf16.mxu0 %v465_v40  ;;  %333 = vmatprep.subr.bf16.mxu1 %v467_v41 }
  0x23   :  { %293 = vmatpush1.bf16.msra.mxu0 %v469_v45  ;;  %334 = vmatpush1.bf16.msra.mxu1 %v470_v46 }
  0x24   :  { %294 = vmatprep.subr.bf16.mxu0 %v268_v49  ;;  %335 = vmatprep.subr.bf16.mxu1 %v274_v50 }
  0x27   :  { %295 = vmatpush1.bf16.msra.mxu0 %v265_v51  ;;  %336 = vmatpush1.bf16.msra.mxu1 %v271_v52 }
  0x2a   :  { %309 = vmatmul.mubr.bf16.vlgmr.msra.gmra.mrb[0].mxu0 %v370_v53  ;;  %350 = vmatmul.mubr.bf16.vlgmr.msra.gmra.mrb[0].mxu1 %v370_v53 }
  0x8c   :  { %v58_v54 = vpop.permute.xlu0 %57 }
  0xfd   :  { %v310_v55 = vpop.f32.mrb[0].mxu0  ;;  %v351_v56 = vpop.f32.mrb[0].mxu1 }
  0xfe   :  { %v311_v57 = vadd.f32 %v310_v55, %v58_v54  ;;  %v352_v58 = vadd.f32 %v351_v56, %v58_v54  ;;  %v312_v59 = vpop.f32.mrb[1].mxu0  ;;  %v353_v60 = vpop.f32.mrb[1].mxu1 }
  0xff   :  { %v313_v61 = vadd.f32 %v312_v59, %v58_v54  ;;  %v354_v62 = vadd.f32 %v353_v60, %v58_v54  ;;  %v314_v63 = vpop.f32.mrb[2].mxu0  ;;  %v355_v0 = vpop.f32.mrb[2].mxu1 }
 0x100   :  { %v358_v1 = vmax.f32 %v311_v57, 0.0  ;;  %v360_v2 = vmax.f32 %v352_v58, 0.0  ;;  %v315_v3 = vpop.f32.mrb[3].mxu0  ;;  %v356_v4 = vpop.f32.mrb[3].mxu1 }
 0x101   :  { %v359_v5 = vmax.f32 %v313_v61, 0.0  ;;  %v361_v6 = vmax.f32 %v354_v62, 0.0 }
 0x102   :  { %362 = vst [vmem:[%s635_s3] sm:$0xff] %v358_v1  ;;  %364 = vst [vmem:[%s635_s3 + $0x10] sm:$0xff] %v360_v2 }
 0x103   :  { %363 = vst [vmem:[%s635_s3 + $0x8] sm:$0xff] %v359_v5  ;;  %365 = vst [vmem:[%s635_s3 + $0x18] sm:$0xff] %v361_v6 }

// kernel: jscc_encoder_forward.11
= control target key start
LH: loop header
LB: loop body
LE: loop exit
PB: predicated region body
PF: predicated region fallthrough
CT: control target
= control target key end

     0   :  { %v164_v0 = vmov 0.0   ;;  %vm165_vm0 = vmmov 0   ;;  %v166_v2 = vmov 0   ;;  %vm74_vm1 = vcmask 1043456   ;;  %s217_s1 = inlined_call_operand.vmem [shape: bf16[72,128], index: 1, kind: input, shape index: {}]   ;;  %s218_s2 = inlined_call_operand.vmem [shape: f32[16,1], index: 2, kind: input, shape index: {}]   ;;  %s219_s0 = inlined_call_operand.vmem [shape: bf16[16,72], index: 0, kind: input, shape index: {}]   ;;  %s220_s3 = inlined_call_operand.vmem [shape: f32[16,128], index: 3, kind: output, shape index: {}]  }
   0x1   :  { %140 = vmatprep.subr.bf16.mxu0 %v164_v0  ;;  %v158_v1 = vld [vmem:[%s217_s1] sm:$0xff]   ;;  %150 = vmatprep.mubr.msk.bf16.mxu0 %vm165_vm0, %v164_v0  ;;  %v159_v3 = vld [vmem:[%s217_s1 + $0x8] sm:$0xff]   ;;  %v160_v5 = vld [vmem:[%s217_s1 + $0x10] sm:$0xff]   ;;  %vm70_vm2 = vcmask 588800  }
   0x2   :  { %157 = vset.pattern.permute.xlu0 %v166_v2  ;;  %141 = vmatpush3.bf16.msra.mxu0 %v158_v1  ;;  %v26_v4 = vld [vmem:[%s218_s2] sm:$0xff]  ;;  %v27_v6 = vld [vmem:[%s218_s2 + $0x8] sm:$0xff]  ;;  %v161_v7 = vld [vmem:[%s217_s1 + $0x18] sm:$0xff]  }
   0x3   :  { %142 = vmatprep.subr.bf16.mxu0 %v164_v0  ;;  %30 = vperm.xlu0 %157, %v26_v4   ;;  %v162_v8 = vld [vmem:[%s217_s1 + $0x20] ss:$0 sps:$4 sm:$0xff]  }
   0x4   :  { %v76_v9 = vsel %vm74_vm1, %v162_v8, 0  ;;  %v163_v10 = vld [vmem:[%s219_s0] sm:$0xff]  }
   0x6   :  { %143 = vmatpush3.bf16.msra.mxu0 %v159_v3 }
   0x7   :  { %144 = vmatprep.subr.bf16.mxu0 %v164_v0  ;;  %35 = vperm.xlu0 %157, %v27_v6  }
   0xa   :  { %145 = vmatpush3.bf16.msra.mxu0 %v160_v5 }
   0xb   :  { %146 = vmatprep.subr.bf16.mxu0 %v164_v0 }
   0xe   :  { %147 = vmatpush3.bf16.msra.mxu0 %v161_v7 }
   0xf   :  { %148 = vmatprep.subr.bf16.mxu0 %v164_v0 }
  0x12   :  { %149 = vmatpush3.bf16.msra.mxu0 %v76_v9 }
  0x15   :  { %151 = vmatmul.mubr.msk.bf16.vlgmr.msra.gmra.mrb[0].mxu0 %vm70_vm2, %v163_v10 }
  0x82   :  { %v31_v11 = vpop.permute.xlu0 %30 }
  0x86   :  { %v36_v15 = vpop.permute.xlu0 %35 }
  0xe8   :  { %v112_v12 = vpop.f32.mrb[0].mxu0 }
  0xe9   :  { %v113_v13 = vadd.f32 %v112_v12, %v31_v11  ;;  %v152_v14 = vpop.f32.mrb[1].mxu0 }
  0xea   :  { %v115_v16 = vpop.f32.mrb[2].mxu0 }
  0xeb   :  { %v119_v17 = vmax.f32 %v113_v13, 0.0  ;;  %v116_v18 = vadd.f32 %v115_v16, %v36_v15  ;;  %v153_v19 = vpop.f32.mrb[3].mxu0 }
  0xed   :  { %121 = vst [vmem:[%s220_s3] sm:$0xff] %v119_v17  ;;  %v120_v20 = vmax.f32 %v116_v18, 0.0 }
  0xef   :  { %122 = vst [vmem:[%s220_s3 + $0x8] sm:$0xff] %v120_v20 }

// kernel: jscc_encoder_forward.12
= control target key start
LH: loop header
LB: loop body
LE: loop exit
PB: predicated region body
PF: predicated region fallthrough
CT: control target
= control target key end

     0   :  { %v252_v0 = vmov 0   ;;  %vm133_vm0 = vcmask 130048   ;;  %s336_s1 = inlined_call_operand.vmem [shape: bf16[144,128], index: 1, kind: input, shape index: {}]   ;;  %s337_s0 = inlined_call_operand.vmem [shape: bf16[32,144], index: 0, kind: input, shape index: {}]   ;;  %s338_s2 = inlined_call_operand.vmem [shape: f32[32,1], index: 2, kind: input, shape index: {}]   ;;  %s339_s3 = inlined_call_operand.vmem [shape: f32[32,128], index: 3, kind: output, shape index: {}]  }
   0x1   :  { %140 = vmatprep.subr.bf16.mxu0 %v252_v0  ;;  %216 = vmatprep.subr.bf16.mxu1 %v252_v0  ;;  %v237_v1 = vld [vmem:[%s336_s1] sm:$0xff]   ;;  %v238_v2 = vld [vmem:[%s336_s1 + $0x8] sm:$0xff]   ;;  %v239_v3 = vld [vmem:[%s336_s1 + $0x10] sm:$0xff]  }
   0x2   :  { %236 = vset.pattern.permute.xlu1 %v252_v0  ;;  %235 = vset.pattern.permute.xlu0 %v252_v0  ;;  %v240_v4 = vld [vmem:[%s336_s1 + $0x18] sm:$0xff]   ;;  %v248_v5 = vld [vmem:[%s337_s0 + $0x4] ss:$8 sps:$4 sm:$0xff]   ;;  %v39_v7 = vld [vmem:[%s338_s2 + $0x10] sm:$0xff] }
   0x3   :  { %141 = vmatpush1.bf16.msra.mxu0 %v237_v1  ;;  %225 = vmatpush1.bf16.msra.mxu1 %v237_v1  ;;  %v251_v6 = vld [vmem:[%s337_s0 + $0x14] ss:$8 sps:$4 sm:$0xff]   ;;  %v37_v8 = vld [vmem:[%s338_s2] sm:$0xff]  ;;  %v38_v11 = vld [vmem:[%s338_s2 + $0x8] sm:$0xff] }
   0x4   :  { %142 = vmatprep.subr.bf16.mxu0 %v252_v0  ;;  %217 = vmatprep.subr.bf16.mxu1 %v252_v0  ;;  %v40_v9 = vld [vmem:[%s338_s2 + $0x18] sm:$0xff]  ;;  %v241_v10 = vld [vmem:[%s336_s1 + $0x20] sm:$0xff]   ;;  %v242_v12 = vld [vmem:[%s336_s1 + $0x28] sm:$0xff]  }
   0x5   :  { %214 = vmatprep.mubr.msk.bf16.mxu0 %vm133_vm0, %v248_v5  ;;  %53 = vperm.xlu1 %236, %v39_v7   ;;  %v243_v13 = vld [vmem:[%s336_s1 + $0x30] sm:$0xff]   ;;  %v244_v14 = vld [vmem:[%s336_s1 + $0x38] sm:$0xff]   ;;  %v245_v15 = vld [vmem:[%s336_s1 + $0x40] sm:$0xff]  }
   0x6   :  { %215 = vmatprep.mubr.msk.bf16.mxu1 %vm133_vm0, %v251_v6  ;;  %43 = vperm.xlu0 %235, %v37_v8   ;;  %v246_v16 = vld [vmem:[%s337_s0] ss:$8 sps:$4 sm:$0xff]   ;;  %v249_v17 = vld [vmem:[%s337_s0 + $0x10] ss:$8 sps:$4 sm:$0xff]  }
   0x7   :  { %143 = vmatpush1.bf16.msra.mxu0 %v238_v2  ;;  %226 = vmatpush1.bf16.msra.mxu1 %v238_v2 }
   0x8   :  { %144 = vmatprep.subr.bf16.mxu0 %v252_v0  ;;  %218 = vmatprep.subr.bf16.mxu1 %v252_v0 }
   0x9   :  { %58 = vperm.xlu1 %236, %v40_v9  }
   0xa   :  { %48 = vperm.xlu0 %235, %v38_v11  }
   0xb   :  { %145 = vmatpush1.bf16.msra.mxu0 %v239_v3  ;;  %227 = vmatpush1.bf16.msra.mxu1 %v239_v3 }
   0xc   :  { %146 = vmatprep.subr.bf16.mxu0 %v252_v0  ;;  %219 = vmatprep.subr.bf16.mxu1 %v252_v0 }
   0xf   :  { %147 = vmatpush1.bf16.msra.mxu0 %v240_v4  ;;  %228 = vmatpush1.bf16.msra.mxu1 %v240_v4 }
  0x10   :  { %148 = vmatprep.subr.bf16.mxu0 %v252_v0  ;;  %220 = vmatprep.subr.bf16.mxu1 %v252_v0 }
  0x13   :  { %149 = vmatpush1.bf16.msra.mxu0 %v241_v10  ;;  %229 = vmatpush1.bf16.msra.mxu1 %v241_v10 }
  0x14   :  { %150 = vmatprep.subr.bf16.mxu0 %v252_v0  ;;  %221 = vmatprep.subr.bf16.mxu1 %v252_v0 }
  0x17   :  { %151 = vmatpush1.bf16.msra.mxu0 %v242_v12  ;;  %230 = vmatpush1.bf16.msra.mxu1 %v242_v12 }
  0x18   :  { %152 = vmatprep.subr.bf16.mxu0 %v252_v0  ;;  %222 = vmatprep.subr.bf16.mxu1 %v252_v0 }
  0x1b   :  { %153 = vmatpush1.bf16.msra.mxu0 %v243_v13  ;;  %231 = vmatpush1.bf16.msra.mxu1 %v243_v13 }
  0x1c   :  { %154 = vmatprep.subr.bf16.mxu0 %v252_v0  ;;  %223 = vmatprep.subr.bf16.mxu1 %v252_v0 }
  0x1f   :  { %155 = vmatpush1.bf16.msra.mxu0 %v244_v14  ;;  %232 = vmatpush1.bf16.msra.mxu1 %v244_v14 }
  0x20   :  { %156 = vmatprep.subr.bf16.mxu0 %v252_v0  ;;  %224 = vmatprep.subr.bf16.mxu1 %v252_v0 }
  0x23   :  { %157 = vmatpush1.bf16.msra.mxu0 %v245_v15  ;;  %233 = vmatpush1.bf16.msra.mxu1 %v245_v15 }
  0x26   :  { %173 = vmatmul.mubr.bf16.vlgmr.msra.gmra.mrb[0].mxu0 %v246_v16  ;;  %181 = vmatmul.mubr.bf16.vlgmr.msra.gmra.mrb[0].mxu1 %v249_v17 }
  0x84   :  { %v54_v18 = vpop.permute.xlu1 %53 }
  0x85   :  { %v44_v19 = vpop.permute.xlu0 %43 }
  0x88   :  { %v59_v20 = vpop.permute.xlu1 %58 }
  0x89   :  { %v49_v21 = vpop.permute.xlu0 %48 }
  0xf9   :  { %v174_v22 = vpop.f32.mrb[0].mxu0  ;;  %v182_v23 = vpop.f32.mrb[0].mxu1 }
  0xfa   :  { %v175_v24 = vadd.f32 %v174_v22, %v44_v19  ;;  %v183_v25 = vadd.f32 %v182_v23, %v54_v18  ;;  %v176_v26 = vpop.f32.mrb[1].mxu0  ;;  %v184_v27 = vpop.f32.mrb[1].mxu1 }
  0xfb   :  { %v177_v28 = vpop.f32.mrb[2].mxu0  ;;  %v185_v29 = vpop.f32.mrb[2].mxu1 }
  0xfc   :  { %v189_v30 = vmax.f32 %v175_v24, 0.0  ;;  %v191_v31 = vmax.f32 %v183_v25, 0.0  ;;  %v178_v32 = vadd.f32 %v177_v28, %v49_v21  ;;  %v186_v33 = vadd.f32 %v185_v29, %v59_v20  ;;  %v179_v34 = vpop.f32.mrb[3].mxu0  ;;  %v187_v35 = vpop.f32.mrb[3].mxu1 }
  0xfe   :  { %193 = vst [vmem:[%s339_s3] sm:$0xff] %v189_v30  ;;  %195 = vst [vmem:[%s339_s3 + $0x10] sm:$0xff] %v191_v31  ;;  %v190_v36 = vmax.f32 %v178_v32, 0.0  ;;  %v192_v37 = vmax.f32 %v186_v33, 0.0 }
 0x100   :  { %194 = vst [vmem:[%s339_s3 + $0x8] sm:$0xff] %v190_v36  ;;  %196 = vst [vmem:[%s339_s3 + $0x18] sm:$0xff] %v192_v37 }

// kernel: jscc_encoder_forward.13
= control target key start
LH: loop header
LB: loop body
LE: loop exit
PB: predicated region body
PF: predicated region fallthrough
CT: control target
= control target key end

     0   :  { %v433_v1 = vmov 0   ;;  %vm221_vm0 = vcmask 261120   ;;  %s552_s1 = inlined_call_operand.vmem [shape: bf16[288,128], index: 1, kind: input, shape index: {}]   ;;  %s553_s0 = inlined_call_operand.vmem [shape: bf16[32,288], index: 0, kind: input, shape index: {}]   ;;  %s554_s2 = inlined_call_operand.vmem [shape: f32[32,1], index: 2, kind: input, shape index: {}]   ;;  %s555_s3 = inlined_call_operand.vmem [shape: f32[32,128], index: 3, kind: output, shape index: {}]  }
   0x1   :  { %v407_v0 = vld [vmem:[%s552_s1 + $0x40] sm:$0xff]   ;;  %405 = vset.pattern.permute.xlu0 %v433_v1  ;;  %406 = vset.pattern.permute.xlu1 %v433_v1  ;;  %v409_v3 = vld [vmem:[%s552_s1 + $0x48] sm:$0xff]   ;;  %v411_v5 = vld [vmem:[%s552_s1 + $0x50] sm:$0xff]  }
   0x2   :  { %v408_v2 = vld [vmem:[%s552_s1] sm:$0xff]   ;;  %364 = vmatprep.subr.bf16.mxu0 %v407_v0  ;;  %v410_v4 = vld [vmem:[%s552_s1 + $0x8] sm:$0xff]   ;;  %v412_v6 = vld [vmem:[%s552_s1 + $0x10] sm:$0xff]  }
   0x3   :  { %365 = vmatpush3.bf16.msra.mxu0 %v408_v2  ;;  %v413_v7 = vld [vmem:[%s552_s1 + $0x58] sm:$0xff]   ;;  %v415_v9 = vld [vmem:[%s552_s1 + $0x60] sm:$0xff]   ;;  %v417_v12 = vld [vmem:[%s552_s1 + $0x68] sm:$0xff]  }
   0x4   :  { %366 = vmatprep.subr.bf16.mxu0 %v409_v3  ;;  %v414_v8 = vld [vmem:[%s552_s1 + $0x18] sm:$0xff]   ;;  %v416_v10 = vld [vmem:[%s552_s1 + $0x20] sm:$0xff]   ;;  %v418_v13 = vld [vmem:[%s552_s1 + $0x28] sm:$0xff]  }
   0x5   :  { %v422_v11 = vld [vmem:[%s552_s1 + $0x80] sm:$0xff]   ;;  %v419_v14 = vld [vmem:[%s552_s1 + $0x70] sm:$0xff]   ;;  %v427_v16 = vld [vmem:[%s552_s1 + $0x88] sm:$0xff]  }
   0x6   :  { %396 = vmatprep.subr.bf16.mxu1 %v422_v11  ;;  %v426_v15 = vld [vmem:[%s553_s0 + $0x4] ss:$12 sps:$4 sm:$0xff]   ;;  %v428_v17 = vld [vmem:[%s553_s0 + $0x8] ss:$12 sps:$4 sm:$0xff]   ;;  %v429_v18 = vld [vmem:[%s553_s0 + $0x20] ss:$12 sps:$4 sm:$0xff]  }
   0x7   :  { %367 = vmatpush3.bf16.msra.mxu0 %v410_v4  ;;  %397 = vmatpush3.bf16.msra.mxu1 %v422_v11  ;;  %v59_v19 = vld [vmem:[%s554_s2] sm:$0xff]  ;;  %v420_v20 = vld [vmem:[%s552_s1 + $0x30] sm:$0xff]   ;;  %v421_v22 = vld [vmem:[%s552_s1 + $0x78] sm:$0xff]  }
   0x8   :  { %368 = vmatprep.subr.bf16.mxu0 %v411_v5  ;;  %260 = vmatprep.mubr.bf16.mxu0 %v426_v15  ;;  %v61_v21 = vld [vmem:[%s554_s2 + $0x10] sm:$0xff]  ;;  %v60_v23 = vld [vmem:[%s554_s2 + $0x8] sm:$0xff]  ;;  %v62_v24 = vld [vmem:[%s554_s2 + $0x18] sm:$0xff] }
   0x9   :  { %398 = vmatprep.subr.bf16.mxu1 %v427_v16  ;;  %400 = vmatprep.mubr.msk.bf16.mxu1 %vm221_vm0, %v428_v17  ;;  %v423_v25 = vld [vmem:[%s552_s1 + $0x38] sm:$0xff]   ;;  %v424_v26 = vld [vmem:[%s553_s0] ss:$12 sps:$4 sm:$0xff]  }
   0xa   :  { %65 = vperm.xlu0 %405, %v59_v19   ;;  %75 = vperm.xlu1 %406, %v61_v21   ;;  %v430_v27 = vld [vmem:[%s553_s0 + $0x1c] ss:$12 sps:$4 sm:$0xff]   ;;  %v432_v28 = vld [vmem:[%s553_s0 + $0x18] ss:$12 sps:$4 sm:$0xff]  }
   0xb   :  { %369 = vmatpush3.bf16.msra.mxu0 %v412_v6  ;;  %399 = vmatpush3.bf16.msra.mxu1 %v427_v16 }
   0xc   :  { %370 = vmatprep.subr.bf16.mxu0 %v413_v7 }
   0xe   :  { %401 = vmatmul.mubr.msk.bf16.vlgmr.msra.gmra.mrb[0].mxu1 %vm221_vm0, %v429_v18  ;;  %70 = vperm.xlu0 %405, %v60_v23  }
   0xf   :  { %371 = vmatpush3.bf16.msra.mxu0 %v414_v8  ;;  %80 = vperm.xlu1 %406, %v62_v24  }
  0x10   :  { %372 = vmatprep.subr.bf16.mxu0 %v415_v9 }
  0x13   :  { %373 = vmatpush3.bf16.msra.mxu0 %v416_v10 }
  0x14   :  { %374 = vmatprep.subr.bf16.mxu0 %v417_v12 }
  0x17   :  { %375 = vmatpush3.bf16.msra.mxu0 %v418_v13 }
  0x18   :  { %376 = vmatprep.subr.bf16.mxu0 %v419_v14 }
  0x1b   :  { %377 = vmatpush3.bf16.msra.mxu0 %v420_v20 }
  0x1c   :  { %378 = vmatprep.subr.bf16.mxu0 %v421_v22 }
  0x1f   :  { %379 = vmatpush3.bf16.msra.mxu0 %v423_v25 }
  0x22   :  { %261 = vmatmul.mubr.bf16.vlgmr.msra.gmra.mrb[0].mxu0 %v424_v26 }
  0x23   :  { %268 = vmatprep.mubr.bf16.mxu0 %v430_v27 }
  0x2a   :  { %269 = vmatmul.mubr.bf16.gmra.mrb[4].mxu0 %v432_v28 }
  0x89   :  { %v66_v33 = vpop.permute.xlu0 %65  ;;  %v76_v44 = vpop.permute.xlu1 %75 }
  0x8d   :  { %v71_v39 = vpop.permute.xlu0 %70 }
  0x8e   :  { %v81_v55 = vpop.permute.xlu1 %80 }
  0xe1   :  { %v402_v29 = vpop.f32.mrb[0].mxu1 }
  0xe2   :  { %v311_v30 = vpop.f32.mrb[1].mxu1 }
  0xe3   :  { %v403_v31 = vpop.f32.mrb[2].mxu1 }
  0xe4   :  { %v314_v32 = vpop.f32.mrb[3].mxu1 }
  0xf5   :  { %v380_v34 = vpop.f32.mrb[0].mxu0 }
  0xf6   :  { %v381_v35 = vpop.f32.mrb[1].mxu0 }
  0xf7   :  { %v382_v36 = vadd.f32 %v381_v35, %v380_v34  ;;  %v383_v37 = vpop.f32.mrb[2].mxu0 }
  0xf8   :  { %v384_v38 = vpop.f32.mrb[3].mxu0 }
  0xf9   :  { %v385_v40 = vadd.f32 %v384_v38, %v383_v37  ;;  %v263_v41 = vadd.f32 %v382_v36, %v66_v33 }
  0xfb   :  { %v266_v42 = vadd.f32 %v385_v40, %v71_v39  ;;  %v312_v43 = vadd.f32 %v311_v30, %v263_v41 }
  0xfd   :  { %v326_v45 = vmax.f32 %v312_v43, 0.0  ;;  %v315_v46 = vadd.f32 %v314_v32, %v266_v42  ;;  %v386_v47 = vpop.f32.mrb[4].mxu0 }
  0xfe   :  { %v387_v48 = vpop.f32.mrb[5].mxu0 }
  0xff   :  { %330 = vst [vmem:[%s555_s3] sm:$0xff] %v326_v45  ;;  %v327_v49 = vmax.f32 %v315_v46, 0.0  ;;  %v388_v50 = vadd.f32 %v387_v48, %v386_v47  ;;  %v389_v51 = vpop.f32.mrb[6].mxu0 }
 0x100   :  { %v390_v52 = vpop.f32.mrb[7].mxu0 }
 0x101   :  { %331 = vst [vmem:[%s555_s3 + $0x8] sm:$0xff] %v327_v49  ;;  %v271_v53 = vadd.f32 %v388_v50, %v76_v44  ;;  %v391_v54 = vadd.f32 %v390_v52, %v389_v51 }
 0x103   :  { %v320_v56 = vadd.f32 %v402_v29, %v271_v53  ;;  %v274_v57 = vadd.f32 %v391_v54, %v81_v55 }
 0x105   :  { %v328_v58 = vmax.f32 %v320_v56, 0.0  ;;  %v323_v59 = vadd.f32 %v403_v31, %v274_v57 }
 0x107   :  { %332 = vst [vmem:[%s555_s3 + $0x10] sm:$0xff] %v328_v58  ;;  %v329_v60 = vmax.f32 %v323_v59, 0.0 }
 0x109   :  { %333 = vst [vmem:[%s555_s3 + $0x18] sm:$0xff] %v329_v60 }

// kernel: jscc_encoder_forward.14
= control target key start
LH: loop header
LB: loop body
LE: loop exit
PB: predicated region body
PF: predicated region fallthrough
CT: control target
= control target key end

     0   :  { %v663_v1 = vmov 0   ;;  %vm229_vm0 = vcmask 261120   ;;  %vm350_vm1 = vcmask 15360   ;;  %v664_v53 = vmov 0.0   ;;  %s902_s1 = inlined_call_operand.vmem [shape: bf16[288,128], index: 1, kind: input, shape index: {}]   ;;  %s903_s0 = inlined_call_operand.vmem [shape: bf16[32,288], index: 0, kind: input, shape index: {}]   ;;  %s904_s2 = inlined_call_operand.vmem [shape: f32[32,1], index: 2, kind: input, shape index: {}]   ;;  %s905_s4 = inlined_call_operand.vmem [shape: f32[128,2], index: 4, kind: input, shape index: {}]   ;;  %s906_s6 = inlined_call_operand.vmem [shape: f32[32,2], index: 6, kind: output, shape index: {1}]   ;;  %s907_s3 = inlined_call_operand.vmem [shape: f32[32,128], index: 3, kind: input, shape index: {}]   ;;  %s908_s5 = inlined_call_operand.vmem [shape: f32[32,128], index: 5, kind: output, shape index: {0}]  }
   0x1   :  { %v637_v0 = vld [vmem:[%s902_s1 + $0x40] sm:$0xff]   ;;  %635 = vset.pattern.permute.xlu0 %v663_v1  ;;  %636 = vset.pattern.permute.xlu1 %v663_v1  ;;  %v639_v3 = vld [vmem:[%s902_s1 + $0x48] sm:$0xff]   ;;  %v641_v5 = vld [vmem:[%s902_s1 + $0x50] sm:$0xff]   ;;  %352 = vst.msk [vmem:[%s906_s6 + $0x8] sm:$0xff] %vm350_vm1, %v664_v53 }
   0x2   :  { %v638_v2 = vld [vmem:[%s902_s1] sm:$0xff]   ;;  %503 = vmatprep.subr.bf16.mxu0 %v637_v0  ;;  %v640_v4 = vld [vmem:[%s902_s1 + $0x8] sm:$0xff]   ;;  %v642_v6 = vld [vmem:[%s902_s1 + $0x10] sm:$0xff]   ;;  %351 = vst.msk [vmem:[%s906_s6] sm:$0xff] %vm350_vm1, %v664_v53 }
   0x3   :  { %504 = vmatpush3.bf16.msra.mxu0 %v638_v2  ;;  %v643_v7 = vld [vmem:[%s902_s1 + $0x58] sm:$0xff]   ;;  %v645_v9 = vld [vmem:[%s902_s1 + $0x60] sm:$0xff]   ;;  %v647_v12 = vld [vmem:[%s902_s1 + $0x68] sm:$0xff]   ;;  %353 = vst.msk [vmem:[%s906_s6 + $0x10] sm:$0xff] %vm350_vm1, %v664_v53 }
   0x4   :  { %505 = vmatprep.subr.bf16.mxu0 %v639_v3  ;;  %v644_v8 = vld [vmem:[%s902_s1 + $0x18] sm:$0xff]   ;;  %v646_v10 = vld [vmem:[%s902_s1 + $0x20] sm:$0xff]   ;;  %v648_v13 = vld [vmem:[%s902_s1 + $0x28] sm:$0xff]   ;;  %354 = vst.msk [vmem:[%s906_s6 + $0x18] sm:$0xff] %vm350_vm1, %v664_v53 }
   0x5   :  { %v652_v11 = vld [vmem:[%s902_s1 + $0x80] sm:$0xff]   ;;  %v649_v14 = vld [vmem:[%s902_s1 + $0x70] sm:$0xff]   ;;  %v657_v16 = vld [vmem:[%s902_s1 + $0x88] sm:$0xff]  }
   0x6   :  { %555 = vmatprep.subr.bf16.mxu1 %v652_v11  ;;  %v656_v15 = vld [vmem:[%s903_s0 + $0x4] ss:$12 sps:$4 sm:$0xff]   ;;  %v658_v17 = vld [vmem:[%s903_s0 + $0x8] ss:$12 sps:$4 sm:$0xff]   ;;  %v659_v18 = vld [vmem:[%s903_s0 + $0x20] ss:$12 sps:$4 sm:$0xff]  }
   0x7   :  { %506 = vmatpush3.bf16.msra.mxu0 %v640_v4  ;;  %556 = vmatpush3.bf16.msra.mxu1 %v652_v11  ;;  %v650_v19 = vld [vmem:[%s902_s1 + $0x30] sm:$0xff]   ;;  %v67_v20 = vld [vmem:[%s904_s2] sm:$0xff]  ;;  %v651_v21 = vld [vmem:[%s902_s1 + $0x78] sm:$0xff]  }
   0x8   :  { %507 = vmatprep.subr.bf16.mxu0 %v641_v5  ;;  %268 = vmatprep.mubr.bf16.mxu0 %v656_v15  ;;  %v69_v22 = vld [vmem:[%s904_s2 + $0x10] sm:$0xff]  ;;  %v68_v23 = vld [vmem:[%s904_s2 + $0x8] sm:$0xff]  ;;  %v359_v24 = vld [vmem:[%s905_s4] sm:$0xff] }
   0x9   :  { %557 = vmatprep.subr.bf16.mxu1 %v657_v16  ;;  %559 = vmatprep.mubr.msk.bf16.mxu1 %vm229_vm0, %v658_v17  ;;  %v360_v25 = vld [vmem:[%s905_s4 + $0x8] sm:$0xff]  ;;  %v361_v26 = vld [vmem:[%s905_s4 + $0x10] sm:$0xff]  ;;  %v70_v27 = vld [vmem:[%s904_s2 + $0x18] sm:$0xff] }
   0xa   :  { %73 = vperm.xlu0 %635, %v67_v20   ;;  %83 = vperm.xlu1 %636, %v69_v22   ;;  %v601_v28 = vpack.c.bf16 %v360_v25, %v359_v24  ;;  %v362_v29 = vld [vmem:[%s905_s4 + $0x18] sm:$0xff]  ;;  %v363_v32 = vld [vmem:[%s905_s4 + $0x20] sm:$0xff]  ;;  %v364_v33 = vld [vmem:[%s905_s4 + $0x28] sm:$0xff] }
   0xb   :  { %508 = vmatpush3.bf16.msra.mxu0 %v642_v6  ;;  %558 = vmatpush3.bf16.msra.mxu1 %v657_v16  ;;  %v653_v30 = vld [vmem:[%s902_s1 + $0x38] sm:$0xff]   ;;  %v605_v31 = vpack.c.bf16 %v362_v29, %v361_v26  ;;  %v654_v34 = vld [vmem:[%s903_s0] ss:$12 sps:$4 sm:$0xff]   ;;  %v609_v36 = vpack.c.bf16 %v364_v33, %v363_v32  ;;  %v365_v37 = vld [vmem:[%s905_s4 + $0x30] sm:$0xff] }
   0xc   :  { %509 = vmatprep.subr.bf16.mxu0 %v643_v7  ;;  %602 = vmatprep.subr.bf16.mxu1 %v601_v28  ;;  %v660_v35 = vld [vmem:[%s903_s0 + $0x1c] ss:$12 sps:$4 sm:$0xff]   ;;  %v367_v40 = vld [vmem:[%s905_s4 + $0x40] sm:$0xff]  ;;  %v369_v44 = vld [vmem:[%s905_s4 + $0x50] sm:$0xff] }
   0xd   :  { %v366_v38 = vld [vmem:[%s905_s4 + $0x38] sm:$0xff]  ;;  %v368_v41 = vld [vmem:[%s905_s4 + $0x48] sm:$0xff]  ;;  %v371_v47 = vld [vmem:[%s905_s4 + $0x60] sm:$0xff] }
   0xe   :  { %560 = vmatmul.mubr.msk.bf16.vlgmr.msra.gmra.mrb[0].mxu1 %vm229_vm0, %v659_v18  ;;  %78 = vperm.xlu0 %635, %v68_v23   ;;  %v613_v39 = vpack.c.bf16 %v366_v38, %v365_v37  ;;  %v662_v42 = vld [vmem:[%s903_s0 + $0x18] ss:$12 sps:$4 sm:$0xff]   ;;  %v617_v43 = vpack.c.bf16 %v368_v41, %v367_v40  ;;  %v372_v48 = vld [vmem:[%s905_s4 + $0x68] sm:$0xff]  ;;  %v373_v50 = vld [vmem:[%s905_s4 + $0x70] sm:$0xff] }
   0xf   :  { %510 = vmatpush3.bf16.msra.mxu0 %v644_v8  ;;  %88 = vperm.xlu1 %636, %v70_v27   ;;  %v370_v45 = vld [vmem:[%s905_s4 + $0x58] sm:$0xff]  ;;  %v625_v49 = vpack.c.bf16 %v372_v48, %v371_v47  ;;  %v334_v3 = vld [vmem:[%s907_s3] sm:$0xff]  ;;  %v335_v7 = vld [vmem:[%s907_s3 + $0x8] sm:$0xff] }
  0x10   :  { %511 = vmatprep.subr.bf16.mxu0 %v645_v9  ;;  %604 = vmatpush3.bf16.msra.mxu1 %v601_v28  ;;  %v621_v46 = vpack.c.bf16 %v370_v45, %v369_v44  ;;  %v374_v51 = vld [vmem:[%s905_s4 + $0x78] sm:$0xff]  ;;  %v356_v26 = vld [vmem:[%s906_s6 + $0x8] sm:$0xff]  ;;  %v355_v27 = vld [vmem:[%s906_s6] sm:$0xff] }
  0x11   :  { %606 = vmatprep.subr.bf16.mxu1 %v605_v31  ;;  %v629_v52 = vpack.c.bf16 %v374_v51, %v373_v50  ;;  %v337_v22 = vld [vmem:[%s907_s3 + $0x18] sm:$0xff]  ;;  %v357_v33 = vld [vmem:[%s906_s6 + $0x10] sm:$0xff] }
  0x12   :  { %v358_v32 = vld [vmem:[%s906_s6 + $0x18] sm:$0xff] }
  0x13   :  { %512 = vmatpush3.bf16.msra.mxu0 %v646_v10 }
  0x14   :  { %513 = vmatprep.subr.bf16.mxu0 %v647_v12  ;;  %608 = vmatpush3.bf16.msra.mxu1 %v605_v31 }
  0x15   :  { %610 = vmatprep.subr.bf16.mxu1 %v609_v36 }
  0x17   :  { %514 = vmatpush3.bf16.msra.mxu0 %v648_v13 }
  0x18   :  { %515 = vmatprep.subr.bf16.mxu0 %v649_v14  ;;  %612 = vmatpush3.bf16.msra.mxu1 %v609_v36 }
  0x19   :  { %614 = vmatprep.subr.bf16.mxu1 %v613_v39 }
  0x1b   :  { %516 = vmatpush3.bf16.msra.mxu0 %v650_v19  ;;  %v336_v19 = vld [vmem:[%s907_s3 + $0x10] sm:$0xff] }
  0x1c   :  { %517 = vmatprep.subr.bf16.mxu0 %v651_v21  ;;  %616 = vmatpush3.bf16.msra.mxu1 %v613_v39 }
  0x1d   :  { %618 = vmatprep.subr.bf16.mxu1 %v617_v43 }
  0x1f   :  { %518 = vmatpush3.bf16.msra.mxu0 %v653_v30 }
  0x20   :  { %620 = vmatpush3.bf16.msra.mxu1 %v617_v43 }
  0x21   :  { %622 = vmatprep.subr.bf16.mxu1 %v621_v46 }
  0x22   :  { %269 = vmatmul.mubr.bf16.vlgmr.msra.gmra.mrb[0].mxu0 %v654_v34 }
  0x23   :  { %276 = vmatprep.mubr.bf16.mxu0 %v660_v35 }
  0x24   :  { %624 = vmatpush3.bf16.msra.mxu1 %v621_v46 }
  0x25   :  { %626 = vmatprep.subr.bf16.mxu1 %v625_v49 }
  0x28   :  { %628 = vmatpush3.bf16.msra.mxu1 %v625_v49 }
  0x29   :  { %630 = vmatprep.subr.bf16.mxu1 %v629_v52 }
  0x2a   :  { %277 = vmatmul.mubr.bf16.gmra.mrb[4].mxu0 %v662_v42 }
  0x2c   :  { %632 = vmatpush3.bf16.msra.mxu1 %v629_v52 }
  0x89   :  { %v74_v58 = vpop.permute.xlu0 %73  ;;  %v84_v6 = vpop.permute.xlu1 %83 }
  0x8d   :  { %v79_v0 = vpop.permute.xlu0 %78 }
  0x8e   :  { %v89_v18 = vpop.permute.xlu1 %88 }
  0xe1   :  { %v561_v54 = vpop.f32.mrb[0].mxu1 }
  0xe2   :  { %v319_v55 = vpop.f32.mrb[1].mxu1 }
  0xe3   :  { %v562_v56 = vpop.f32.mrb[2].mxu1 }
  0xe4   :  { %v322_v57 = vpop.f32.mrb[3].mxu1 }
  0xf5   :  { %v519_v59 = vpop.f32.mrb[0].mxu0 }
  0xf6   :  { %v520_v60 = vpop.f32.mrb[1].mxu0 }
  0xf7   :  { %v521_v61 = vadd.f32 %v520_v60, %v519_v59  ;;  %v522_v62 = vpop.f32.mrb[2].mxu0 }
  0xf8   :  { %v523_v63 = vpop.f32.mrb[3].mxu0 }
  0xf9   :  { %v524_v1 = vadd.f32 %v523_v63, %v522_v62  ;;  %v271_v2 = vadd.f32 %v521_v61, %v74_v58 }
  0xfb   :  { %v274_v4 = vadd.f32 %v524_v1, %v79_v0  ;;  %v320_v5 = vadd.f32 %v319_v55, %v271_v2 }
  0xfd   :  { %v338_v8 = vadd.f32 %v334_v3, %v320_v5  ;;  %v323_v9 = vadd.f32 %v322_v57, %v274_v4  ;;  %v525_v10 = vpop.f32.mrb[4].mxu0 }
  0xfe   :  { %v526_v11 = vpop.f32.mrb[5].mxu0 }
  0xff   :  { %342 = vst [vmem:[%s908_s5] sm:$0xff] %v338_v8  ;;  %v339_v12 = vadd.f32 %v335_v7, %v323_v9  ;;  %v527_v13 = vadd.f32 %v526_v11, %v525_v10  ;;  %v528_v14 = vpop.f32.mrb[6].mxu0  ;;  %595 = vmatprep.mubr.f32.mxu1 %v338_v8 }
 0x100   :  { %v529_v15 = vpop.f32.mrb[7].mxu0 }
 0x101   :  { %343 = vst [vmem:[%s908_s5 + $0x8] sm:$0xff] %v339_v12  ;;  %v279_v16 = vadd.f32 %v527_v13, %v84_v6  ;;  %v530_v17 = vadd.f32 %v529_v15, %v528_v14  ;;  %596 = vmatmul.mubr.f32.vlgmr.msra.gmra.mrb[4].mxu1 %v339_v12 }
 0x103   :  { %v328_v20 = vadd.f32 %v561_v54, %v279_v16  ;;  %v282_v21 = vadd.f32 %v530_v17, %v89_v18 }
 0x105   :  { %v331_v23 = vadd.f32 %v562_v56, %v282_v21  ;;  %v340_v24 = vadd.f32 %v336_v19, %v328_v20 }
 0x107   :  { %344 = vst [vmem:[%s908_s5 + $0x10] sm:$0xff] %v340_v24  ;;  %598 = vmatprep.mubr.f32.mxu1 %v340_v24  ;;  %v341_v25 = vadd.f32 %v337_v22, %v331_v23 }
 0x109   :  { %345 = vst [vmem:[%s908_s5 + $0x18] sm:$0xff] %v341_v25  ;;  %599 = vmatmul.mubr.f32.gmra.mrb[6].mxu1 %v341_v25 }
 0x1d4   :  { %v597_v28 = vpop.f32.mrb[4].mxu1 }
 0x1d5   :  { %v461_v29 = vadd.f32 %v597_v28, %v356_v26  ;;  %v441_v30 = vpop.f32.mrb[5].mxu1 }
 0x1d6   :  { %v460_v31 = vadd.f32 %v441_v30, %v355_v27 }
 0x1d7   :  { %466 = vst.msk [vmem:[%s906_s6 + $0x8] sm:$0xff] %vm350_vm1, %v461_v29 }
 0x1d8   :  { %465 = vst.msk [vmem:[%s906_s6] sm:$0xff] %vm350_vm1, %v460_v31 }
 0x1dc   :  { %v600_v34 = vpop.f32.mrb[6].mxu1 }
 0x1dd   :  { %v463_v35 = vadd.f32 %v600_v34, %v358_v32  ;;  %v451_v36 = vpop.f32.mrb[7].mxu1 }
 0x1de   :  { %v462_v37 = vadd.f32 %v451_v36, %v357_v33 }
 0x1df   :  { %468 = vst.msk [vmem:[%s906_s6 + $0x18] sm:$0xff] %vm350_vm1, %v463_v35 }
 0x1e0   :  { %467 = vst.msk [vmem:[%s906_s6 + $0x10] sm:$0xff] %vm350_vm1, %v462_v37 }

// kernel: jscc_encoder_forward.15
= control target key start
LH: loop header
LB: loop body
LE: loop exit
PB: predicated region body
PF: predicated region fallthrough
CT: control target
= control target key end

     0   :  { %vm55_vm0 = vcmask 261120   ;;  %v1297_v19 = vmov 0   ;;  %vm306_vm1 = vcmask 15360   ;;  %vm1101_vm2 = vcmask 123904   ;;  %s1877_s1 = inlined_call_operand.vmem [shape: f32[32,2], index: 1, kind: input, shape index: {}]   ;;  %s1878_s2 = inlined_call_operand.vmem [shape: f32[32,32], index: 2, kind: input, shape index: {}]   ;;  %s1879_s6 = inlined_call_operand.vmem [shape: f32[32,32], index: 6, kind: input, shape index: {}]   ;;  %s1880_s4 = inlined_call_operand.vmem [shape: f32[32,32], index: 4, kind: input, shape index: {}]   ;;  %s1881_s5 = inlined_call_operand.vmem [shape: f32[32,1], index: 5, kind: input, shape index: {}]   ;;  %s1882_s9 = inlined_call_operand.vmem [shape: f32[32,1], index: 9, kind: input, shape index: {}]   ;;  %s1883_s3 = inlined_call_operand.vmem [shape: f32[32,2], index: 3, kind: input, shape index: {}]   ;;  %s1884_s7 = inlined_call_operand.vmem [shape: f32[32,2], index: 7, kind: input, shape index: {}]   ;;  %s1885_s8 = inlined_call_operand.vmem [shape: f32[32,32], index: 8, kind: input, shape index: {}]   ;;  %s1886_s0 = inlined_call_operand.vmem [shape: f32[32,2,16], index: 0, kind: input, shape index: {}]   ;;  %s1887_s10 = inlined_call_operand.vmem [shape: f32[32,2,16], index: 10, kind: output, shape index: {}]  }
   0x1   :  { %v39_v0 = vld [vmem:[%s1877_s1] sm:$0xff]  ;;  %v40_v1 = vld [vmem:[%s1877_s1 + $0x8] sm:$0xff]  ;;  %v41_v2 = vld [vmem:[%s1877_s1 + $0x10] sm:$0xff]  ;;  %1280 = vset.pattern.permute.xlu1 %v1297_v19  ;;  %1279 = vset.pattern.permute.xlu0 %v1297_v19 }
   0x2   :  { %v43_v3 = vmul.f32 0.0625, %v39_v0  ;;  %v44_v4 = vmul.f32 0.0625, %v40_v1  ;;  %v42_v5 = vld [vmem:[%s1877_s1 + $0x18] sm:$0xff]  ;;  %v45_v6 = vmul.f32 0.0625, %v41_v2  ;;  %v47_v7 = vld [vmem:[%s1878_s2] sm:$0xff]  ;;  %v48_v11 = vld [vmem:[%s1878_s2 + $0x8] sm:$0xff] }
   0x3   :  { %v46_v8 = vmul.f32 0.0625, %v42_v5  ;;  %1198 = vmatprep.mubr.msk.f32.mxu0 %vm55_vm0, %v47_v7  ;;  %v49_v12 = vld [vmem:[%s1878_s2 + $0x10] sm:$0xff]  ;;  %v50_v13 = vld [vmem:[%s1878_s2 + $0x18] sm:$0xff]  ;;  %v311_v14 = vld [vmem:[%s1879_s6] sm:$0xff] }
   0x4   :  { %v1246_v9 = vpack.c.bf16 %v44_v4, %v43_v3  ;;  %v312_v15 = vld [vmem:[%s1879_s6 + $0x8] sm:$0xff]  ;;  %v313_v16 = vld [vmem:[%s1879_s6 + $0x10] sm:$0xff]  ;;  %v314_v17 = vld [vmem:[%s1879_s6 + $0x18] sm:$0xff] }
   0x5   :  { %v1250_v10 = vpack.c.bf16 %v46_v8, %v45_v6  ;;  %v157_v18 = vld [vmem:[%s1880_s4] sm:$0xff]  ;;  %v163_v20 = vld [vmem:[%s1881_s5 + $0x10] sm:$0xff]  ;;  %v164_v22 = vld [vmem:[%s1881_s5 + $0x18] sm:$0xff] }
   0x6   :  { %1247 = vmatprep.subr.bf16.mxu0 %v1246_v9  ;;  %1212 = vmatprep.mubr.msk.f32.mxu1 %vm55_vm0, %v157_v18  ;;  %v161_v21 = vld [vmem:[%s1881_s5] sm:$0xff]  ;;  %v162_v23 = vld [vmem:[%s1881_s5 + $0x8] sm:$0xff]  ;;  %v427_v26 = vld [vmem:[%s1882_s9 + $0x18] sm:$0xff] }
   0x7   :  { %1249 = vmatpush3.bf16.msra.mxu0 %v1246_v9  ;;  %177 = vperm.xlu1 %1280, %v163_v20   ;;  %v425_v24 = vld [vmem:[%s1882_s9 + $0x8] sm:$0xff]  ;;  %v424_v25 = vld [vmem:[%s1882_s9] sm:$0xff]  ;;  %v426_v27 = vld [vmem:[%s1882_s9 + $0x10] sm:$0xff] }
   0x8   :  { %1251 = vmatprep.subr.bf16.mxu0 %v1250_v10  ;;  %167 = vperm.xlu0 %1279, %v161_v21   ;;  %v52_v28 = vld [vmem:[%s1883_s3 + $0x8] sm:$0xff]  ;;  %v51_v29 = vld [vmem:[%s1883_s3] sm:$0xff]  ;;  %v54_v34 = vld [vmem:[%s1883_s3 + $0x18] sm:$0xff] }
   0x9   :  { %v53_v36 = vld [vmem:[%s1883_s3 + $0x10] sm:$0xff]  ;;  %v316_v43 = vld [vmem:[%s1884_s7 + $0x8] sm:$0xff]  ;;  %v315_v45 = vld [vmem:[%s1884_s7] sm:$0xff] }
   0xa   :  { %v318_v52 = vld [vmem:[%s1884_s7 + $0x18] sm:$0xff]  ;;  %v317_v54 = vld [vmem:[%s1884_s7 + $0x10] sm:$0xff]  ;;  %v158_v59 = vld [vmem:[%s1880_s4 + $0x8] sm:$0xff] }
   0xb   :  { %1253 = vmatpush3.bf16.msra.mxu0 %v1250_v10  ;;  %182 = vperm.xlu1 %1280, %v164_v22   ;;  %v159_v62 = vld [vmem:[%s1880_s4 + $0x10] sm:$0xff]  ;;  %v160_v1 = vld [vmem:[%s1880_s4 + $0x18] sm:$0xff]  ;;  %v420_v3 = vld [vmem:[%s1885_s8] sm:$0xff] }
   0xc   :  { %1263 = vmatprep.subr.bf16.mxu0 %v1246_v9  ;;  %172 = vperm.xlu0 %1279, %v162_v23   ;;  %v421_v4 = vld [vmem:[%s1885_s8 + $0x8] sm:$0xff]  ;;  %v422_v5 = vld [vmem:[%s1885_s8 + $0x10] sm:$0xff]  ;;  %v423_v6 = vld [vmem:[%s1885_s8 + $0x18] sm:$0xff] }
   0xe   :  { %1199 = vmatmul.mubr.msk.f32.vlgmr.msra.gmra.mrb[0].mxu0 %vm55_vm0, %v48_v11 }
   0xf   :  { %1265 = vmatpush3.bf16.msra.mxu0 %v1246_v9  ;;  %1201 = vmatprep.mubr.msk.f32.mxu0 %vm55_vm0, %v49_v12 }
  0x10   :  { %1267 = vmatprep.subr.bf16.mxu0 %v1250_v10  ;;  %435 = vperm.xlu1 %1280, %v425_v24   ;;  %v589_v24 = vlaneseq }
  0x11   :  { %430 = vperm.xlu0 %1279, %v424_v25  }
  0x12   :  { %1202 = vmatmul.mubr.msk.f32.gmra.mrb[2].mxu0 %vm55_vm0, %v50_v13 }
  0x13   :  { %1269 = vmatpush3.bf16.msra.mxu0 %v1250_v10  ;;  %1226 = vmatprep.mubr.msk.f32.mxu0 %vm55_vm0, %v311_v14 }
  0x14   :  { %445 = vperm.xlu1 %1280, %v427_v26  }
  0x15   :  { %440 = vperm.xlu0 %1279, %v426_v27  }
  0x16   :  { %1227 = vmatmul.mubr.msk.f32.vlgmr.msra.gmra.mrb[4].mxu0 %vm55_vm0, %v312_v15 }
  0x17   :  { %1229 = vmatprep.mubr.msk.f32.mxu0 %vm55_vm0, %v313_v16 }
  0x1a   :  { %1230 = vmatmul.mubr.msk.f32.gmra.mrb[6].mxu0 %vm55_vm0, %v314_v17 }
  0x86   :  { %v178_v8 = vpop.permute.xlu1 %177 }
  0x87   :  { %v168_v7 = vpop.permute.xlu0 %167 }
  0x8a   :  { %v183_v10 = vpop.permute.xlu1 %182 }
  0x8b   :  { %v173_v9 = vpop.permute.xlu0 %172 }
  0x8f   :  { %v436_v20 = vpop.permute.xlu1 %435 }
  0x90   :  { %v431_v23 = vpop.permute.xlu0 %430 }
  0xe1   :  { %v1200_v30 = vpop.f32.mrb[0].mxu0 }
  0xe2   :  { %v140_v31 = vadd.f32 %v1200_v30, %v52_v28  ;;  %v134_v32 = vpop.f32.mrb[1].mxu0  ;;  %v441_v30 = vpop.permute.xlu0 %440 }
  0xe3   :  { %v135_v33 = vadd.f32 %v134_v32, %v51_v29  ;;  %v446_v32 = vpop.permute.xlu1 %445 }
  0xe4   :  { %v154_v35 = vmax.f32 %v140_v31, 0.0  ;;  %v590_v31 = vshrl.u32 %v589_v24, 7 }
  0xe5   :  { %v153_v37 = vmax.f32 %v135_v33, 0.0  ;;  %v1203_v38 = vpop.f32.mrb[2].mxu0 }
  0xe6   :  { %v150_v39 = vadd.f32 %v1203_v38, %v54_v34  ;;  %v144_v40 = vpop.f32.mrb[3].mxu0  ;;  %v1480_v38 = vsub.s32 1, %v590_v31 }
  0xe7   :  { %v145_v41 = vadd.f32 %v144_v40, %v53_v36  ;;  %v1254_v42 = vpack.c.bf16 %v154_v35, %v153_v37 }
  0xe8   :  { %v156_v44 = vmax.f32 %v150_v39, 0.0  ;;  %v1482_v39 = vsub.s32 0, %v590_v31 }
  0xe9   :  { %v155_v46 = vmax.f32 %v145_v41, 0.0  ;;  %1255 = vmatprep.subr.bf16.mxu1 %v1254_v42  ;;  %v1228_v47 = vpop.f32.mrb[4].mxu0 }
  0xea   :  { %v403_v48 = vadd.f32 %v1228_v47, %v316_v43  ;;  %1257 = vmatpush3.bf16.msra.mxu1 %v1254_v42  ;;  %v397_v49 = vpop.f32.mrb[5].mxu0 }
  0xeb   :  { %v1258_v50 = vpack.c.bf16 %v156_v44, %v155_v46  ;;  %v398_v51 = vadd.f32 %v397_v49, %v315_v45  ;;  %v1485_v44 = vsub.s32 3, %v590_v31 }
  0xec   :  { %v417_v53 = vmax.f32 %v403_v48, 0.0  ;;  %v1489_v48 = vsub.s32 2, %v590_v31 }
  0xed   :  { %v416_v55 = vmax.f32 %v398_v51, 0.0  ;;  %1259 = vmatprep.subr.bf16.mxu1 %v1258_v50  ;;  %v1231_v56 = vpop.f32.mrb[6].mxu0 }
  0xee   :  { %v413_v57 = vadd.f32 %v1231_v56, %v318_v52  ;;  %1261 = vmatpush3.bf16.msra.mxu1 %v1258_v50  ;;  %v407_v58 = vpop.f32.mrb[7].mxu0  ;;  %v1491_v52 = vsub.s32 5, %v590_v31 }
  0xef   :  { %v1270_v60 = vpack.c.bf16 %v417_v53, %v416_v55  ;;  %v408_v61 = vadd.f32 %v407_v58, %v317_v54  ;;  %v1495_v55 = vsub.s32 4, %v590_v31  ;;  %v1501_v58 = vsub.s32 6, %v590_v31 }
  0xf0   :  { %v419_v63 = vmax.f32 %v413_v57, 0.0  ;;  %v1499_v57 = vsub.s32 7, %v590_v31 }
  0xf1   :  { %v418_v0 = vmax.f32 %v408_v61, 0.0  ;;  %1213 = vmatmul.mubr.msk.f32.vlgmr.msra.gmra.mrb[0].mxu1 %vm55_vm0, %v158_v59  ;;  %1271 = vmatprep.subr.bf16.mxu1 %v1270_v60 }
  0xf2   :  { %1273 = vmatpush3.bf16.msra.mxu1 %v1270_v60  ;;  %1215 = vmatprep.mubr.msk.f32.mxu1 %vm55_vm0, %v159_v62 }
  0xf3   :  { %v1274_v2 = vpack.c.bf16 %v419_v63, %v418_v0 }
  0xf5   :  { %1216 = vmatmul.mubr.msk.f32.gmra.mrb[2].mxu1 %vm55_vm0, %v160_v1  ;;  %1275 = vmatprep.subr.bf16.mxu1 %v1274_v2 }
  0xf6   :  { %1277 = vmatpush3.bf16.msra.mxu1 %v1274_v2  ;;  %1240 = vmatprep.mubr.msk.f32.mxu1 %vm55_vm0, %v420_v3 }
  0xf9   :  { %1241 = vmatmul.mubr.msk.f32.vlgmr.msra.gmra.mrb[4].mxu1 %vm55_vm0, %v421_v4 }
  0xfa   :  { %1243 = vmatprep.mubr.msk.f32.mxu1 %vm55_vm0, %v422_v5 }
  0xfd   :  { %1244 = vmatmul.mubr.msk.f32.gmra.mrb[6].mxu1 %vm55_vm0, %v423_v6 }
 0x1c4   :  { %v1214_v11 = vpop.f32.mrb[0].mxu1 }
 0x1c5   :  { %v269_v12 = vadd.f32 %v1214_v11, %v173_v9  ;;  %v263_v13 = vpop.f32.mrb[1].mxu1 }
 0x1c6   :  { %v264_v14 = vadd.f32 %v263_v13, %v168_v7 }
 0x1c7   :  { %v1147_v15 = vmul.f32 -1.442695, %v269_v12 }
 0x1c8   :  { %v1146_v16 = vmul.f32 -1.442695, %v264_v14  ;;  %v1217_v17 = vpop.f32.mrb[2].mxu1 }
 0x1c9   :  { %1281 = vpow2.f32 %v1147_v15  ;;  %v279_v18 = vadd.f32 %v1217_v17, %v183_v10  ;;  %v273_v19 = vpop.f32.mrb[3].mxu1 }
 0x1ca   :  { %1283 = vpow2.f32 %v1146_v16  ;;  %v274_v21 = vadd.f32 %v273_v19, %v178_v8 }
 0x1cb   :  { %v1149_v22 = vmul.f32 -1.442695, %v279_v18 }
 0x1cc   :  { %v1148_v25 = vmul.f32 -1.442695, %v274_v21  ;;  %v1242_v26 = vpop.f32.mrb[4].mxu1 }
 0x1cd   :  { %1285 = vpow2.f32 %v1149_v22  ;;  %v532_v27 = vadd.f32 %v1242_v26, %v436_v20  ;;  %v526_v28 = vpop.f32.mrb[5].mxu1 }
 0x1ce   :  { %1287 = vpow2.f32 %v1148_v25  ;;  %v527_v29 = vadd.f32 %v526_v28, %v431_v23 }
 0x1cf   :  { %546 = vst.msk [vmem:[#allocation3 + $0x8] sm:$0xff] %vm306_vm1, %v532_v27 }
 0x1d0   :  { %545 = vst.msk [vmem:[#allocation3] sm:$0xff] %vm306_vm1, %v527_v29  ;;  %v1245_v33 = vpop.f32.mrb[6].mxu1 }
 0x1d1   :  { %v542_v34 = vadd.f32 %v1245_v33, %v446_v32  ;;  %v536_v35 = vpop.f32.mrb[7].mxu1 }
 0x1d2   :  { %v537_v36 = vadd.f32 %v536_v35, %v441_v30 }
 0x1d3   :  { %v1282_v37 = vpop.eup %1281  ;;  %548 = vst.msk [vmem:[#allocation3 + $0x18] sm:$0xff] %vm306_vm1, %v542_v34 }
 0x1d4   :  { %v1284_v40 = vpop.eup %1283  ;;  %v295_v41 = vadd.f32 1.0, %v1282_v37  ;;  %547 = vst.msk [vmem:[#allocation3 + $0x10] sm:$0xff] %vm306_vm1, %v537_v36 }
 0x1d5   :  { %v294_v42 = vadd.f32 1.0, %v1284_v40 }
 0x1d6   :  { %1289 = vrcp.f32 %v295_v41  ;;  %v554_v43 = vld [vmem:[#allocation3 + $0x8] sm:$0xff] }
 0x1d7   :  { %v1286_v45 = vpop.eup %1285  ;;  %1291 = vrcp.f32 %v294_v42  ;;  %v911_v46 = vrot.slane %v554_v43, %v1480_v38  ;;  %v904_v47 = vrot.slane %v554_v43, %v1482_v39  ;;  %v925_v53 = vrot.slane %v554_v43, %v1485_v44  ;;  %v553_v4 = vld [vmem:[#allocation3] sm:$0xff] }
 0x1d8   :  { %v1288_v49 = vpop.eup %1287  ;;  %v297_v50 = vadd.f32 1.0, %v1286_v45  ;;  %v918_v54 = vrot.slane %v554_v43, %v1489_v48  ;;  %v939_v59 = vrot.slane %v554_v43, %v1491_v52  ;;  %v932_v60 = vrot.slane %v554_v43, %v1495_v55 }
 0x1d9   :  { %v296_v51 = vadd.f32 1.0, %v1288_v49  ;;  %913 = vbcast.lane.b32.xlu1 %v911_v46, 256  ;;  %906 = vbcast.lane.b32.xlu0 %v904_v47, 256  ;;  %v953_v1 = vrot.slane %v554_v43, %v1499_v57  ;;  %v946_v2 = vrot.slane %v554_v43, %v1501_v58  ;;  %v855_v6 = vrot.slane %v553_v4, %v1480_v38 }
 0x1da   :  { %1293 = vrcp.f32 %v297_v50  ;;  %v1497_v56 = vld [vmem:[#allocation3 + $0x18] sm:$0xff]  ;;  %v848_v7 = vrot.slane %v553_v4, %v1482_v39  ;;  %v869_v8 = vrot.slane %v553_v4, %v1485_v44  ;;  %v862_v9 = vrot.slane %v553_v4, %v1489_v48 }
 0x1db   :  { %1295 = vrcp.f32 %v296_v51  ;;  %v1065_v62 = vrot.slane %v1497_v56, %v1499_v57  ;;  %v1058_v63 = vrot.slane %v1497_v56, %v1501_v58  ;;  %v883_v10 = vrot.slane %v553_v4, %v1491_v52  ;;  %v555_v20 = vld [vmem:[#allocation3 + $0x10] sm:$0xff] }
 0x1dc   :  { %v876_v11 = vrot.slane %v553_v4, %v1495_v55  ;;  %v897_v12 = vrot.slane %v553_v4, %v1499_v57  ;;  %v890_v13 = vrot.slane %v553_v4, %v1501_v58  ;;  %v1023_v14 = vrot.slane %v1497_v56, %v1480_v38 }
 0x1dd   :  { %927 = vbcast.lane.b32.xlu1 %v925_v53, 256  ;;  %920 = vbcast.lane.b32.xlu0 %v918_v54, 256  ;;  %v1016_v15 = vrot.slane %v1497_v56, %v1482_v39  ;;  %v1037_v16 = vrot.slane %v1497_v56, %v1485_v44  ;;  %v1030_v17 = vrot.slane %v1497_v56, %v1489_v48 }
 0x1de   :  { %v1051_v18 = vrot.slane %v1497_v56, %v1491_v52  ;;  %v1044_v19 = vrot.slane %v1497_v56, %v1495_v55  ;;  %v967_v21 = vrot.slane %v555_v20, %v1480_v38  ;;  %v960_v22 = vrot.slane %v555_v20, %v1482_v39 }
 0x1df   :  { %v981_v23 = vrot.slane %v555_v20, %v1485_v44  ;;  %v974_v24 = vrot.slane %v555_v20, %v1489_v48  ;;  %v995_v25 = vrot.slane %v555_v20, %v1491_v52  ;;  %v988_v26 = vrot.slane %v555_v20, %v1495_v55 }
 0x1e0   :  { %v1290_v61 = vpop.eup %1289  ;;  %v1009_v27 = vrot.slane %v555_v20, %v1499_v57  ;;  %v1002_v28 = vrot.slane %v555_v20, %v1501_v58 }
 0x1e1   :  { %v1292_v0 = vpop.eup %1291  ;;  %308 = vst.msk [vmem:[#allocation2 + $0x8] sm:$0xff] %vm306_vm1, %v1290_v61  ;;  %941 = vbcast.lane.b32.xlu1 %v939_v59, 256  ;;  %934 = vbcast.lane.b32.xlu0 %v932_v60, 256 }
 0x1e2   :  { %307 = vst.msk [vmem:[#allocation2] sm:$0xff] %vm306_vm1, %v1292_v0 }
 0x1e4   :  { %v1294_v3 = vpop.eup %1293 }
 0x1e5   :  { %v1296_v5 = vpop.eup %1295  ;;  %310 = vst.msk [vmem:[#allocation2 + $0x18] sm:$0xff] %vm306_vm1, %v1294_v3  ;;  %955 = vbcast.lane.b32.xlu1 %v953_v1, 256  ;;  %948 = vbcast.lane.b32.xlu0 %v946_v2, 256 }
 0x1e6   :  { %309 = vst.msk [vmem:[#allocation2 + $0x10] sm:$0xff] %vm306_vm1, %v1296_v5 }
 0x1e8   :  { %v550_v29 = vld [vmem:[#allocation2 + $0x8] sm:$0xff] }
 0x1e9   :  { %857 = vbcast.lane.b32.xlu1 %v855_v6, 256  ;;  %850 = vbcast.lane.b32.xlu0 %v848_v7, 256  ;;  %v655_v30 = vrot.slane %v550_v29, %v1480_v38  ;;  %v648_v31 = vrot.slane %v550_v29, %v1482_v39  ;;  %v669_v32 = vrot.slane %v550_v29, %v1485_v44  ;;  %v549_v40 = vld [vmem:[#allocation2] sm:$0xff] }
 0x1ea   :  { %v662_v33 = vrot.slane %v550_v29, %v1489_v48  ;;  %v683_v34 = vrot.slane %v550_v29, %v1491_v52  ;;  %v676_v35 = vrot.slane %v550_v29, %v1495_v55  ;;  %v697_v36 = vrot.slane %v550_v29, %v1499_v57 }
 0x1eb   :  { %v690_v37 = vrot.slane %v550_v29, %v1501_v58  ;;  %v599_v41 = vrot.slane %v549_v40, %v1480_v38  ;;  %v592_v42 = vrot.slane %v549_v40, %v1482_v39  ;;  %v613_v43 = vrot.slane %v549_v40, %v1485_v44 }
 0x1ec   :  { %v606_v45 = vrot.slane %v549_v40, %v1489_v48  ;;  %v627_v46 = vrot.slane %v549_v40, %v1491_v52  ;;  %v620_v47 = vrot.slane %v549_v40, %v1495_v55  ;;  %v641_v49 = vrot.slane %v549_v40, %v1499_v57  ;;  %v552_v51 = vld [vmem:[#allocation2 + $0x18] sm:$0xff] }
 0x1ed   :  { %871 = vbcast.lane.b32.xlu1 %v869_v8, 256  ;;  %864 = vbcast.lane.b32.xlu0 %v862_v9, 256  ;;  %v634_v50 = vrot.slane %v549_v40, %v1501_v58  ;;  %v767_v53 = vrot.slane %v552_v51, %v1480_v38  ;;  %v760_v54 = vrot.slane %v552_v51, %v1482_v39  ;;  %v551_v3 = vld [vmem:[#allocation2 + $0x10] sm:$0xff] }
 0x1ee   :  { %v781_v59 = vrot.slane %v552_v51, %v1485_v44  ;;  %v774_v60 = vrot.slane %v552_v51, %v1489_v48  ;;  %v795_v61 = vrot.slane %v552_v51, %v1491_v52  ;;  %v788_v0 = vrot.slane %v552_v51, %v1495_v55  ;;  %v567_v40 = vld [vmem:[%s1886_s0 + $0x14] sm:$0x3] }
 0x1ef   :  { %v809_v1 = vrot.slane %v552_v51, %v1499_v57  ;;  %v802_v2 = vrot.slane %v552_v51, %v1501_v58  ;;  %v711_v4 = vrot.slane %v551_v3, %v1480_v38  ;;  %v704_v5 = vrot.slane %v551_v3, %v1482_v39 }
 0x1f0   :  { %v725_v6 = vrot.slane %v551_v3, %v1485_v44  ;;  %v718_v7 = vrot.slane %v551_v3, %v1489_v48  ;;  %v753_v39 = vrot.slane %v551_v3, %v1499_v57 }
 0x1f1   :  { %885 = vbcast.lane.b32.xlu1 %v883_v10, 256  ;;  %878 = vbcast.lane.b32.xlu0 %v876_v11, 256  ;;  %v739_v10 = vrot.slane %v551_v3, %v1491_v52  ;;  %v732_v11 = vrot.slane %v551_v3, %v1495_v55 }
 0x1f5   :  { %899 = vbcast.lane.b32.xlu1 %v897_v12, 256  ;;  %892 = vbcast.lane.b32.xlu0 %v890_v13, 256  ;;  %v746_v13 = vrot.slane %v551_v3, %v1501_v58 }
 0x1f9   :  { %1025 = vbcast.lane.b32.xlu1 %v1023_v14, 256  ;;  %1018 = vbcast.lane.b32.xlu0 %v1016_v15, 256 }
 0x1fd   :  { %1039 = vbcast.lane.b32.xlu1 %v1037_v16, 256  ;;  %1032 = vbcast.lane.b32.xlu0 %v1030_v17, 256 }
 0x201   :  { %1053 = vbcast.lane.b32.xlu1 %v1051_v18, 256  ;;  %1046 = vbcast.lane.b32.xlu0 %v1044_v19, 256 }
 0x205   :  { %969 = vbcast.lane.b32.xlu1 %v967_v21, 256  ;;  %962 = vbcast.lane.b32.xlu0 %v960_v22, 256 }
 0x209   :  { %983 = vbcast.lane.b32.xlu1 %v981_v23, 256  ;;  %976 = vbcast.lane.b32.xlu0 %v974_v24, 256 }
 0x20d   :  { %997 = vbcast.lane.b32.xlu1 %v995_v25, 256  ;;  %990 = vbcast.lane.b32.xlu0 %v988_v26, 256 }
 0x211   :  { %1011 = vbcast.lane.b32.xlu1 %v1009_v27, 256  ;;  %1004 = vbcast.lane.b32.xlu0 %v1002_v28, 256 }
 0x215   :  { %657 = vbcast.lane.b32.xlu1 %v655_v30, 256  ;;  %650 = vbcast.lane.b32.xlu0 %v648_v31, 256  ;;  %v566_v31 = vld [vmem:[%s1886_s0 + $0x12] sm:$0x3] }
 0x219   :  { %671 = vbcast.lane.b32.xlu1 %v669_v32, 256  ;;  %664 = vbcast.lane.b32.xlu0 %v662_v33, 256  ;;  %v565_v32 = vld [vmem:[%s1886_s0 + $0x10] sm:$0x3] }
 0x21d   :  { %685 = vbcast.lane.b32.xlu1 %v683_v34, 256  ;;  %678 = vbcast.lane.b32.xlu0 %v676_v35, 256 }
 0x221   :  { %699 = vbcast.lane.b32.xlu1 %v697_v36, 256  ;;  %692 = vbcast.lane.b32.xlu0 %v690_v37, 256  ;;  %v568_v37 = vld [vmem:[%s1886_s0 + $0x16] sm:$0x3] }
 0x225   :  { %601 = vbcast.lane.b32.xlu1 %v599_v41, 256  ;;  %594 = vbcast.lane.b32.xlu0 %v592_v42, 256 }
 0x229   :  { %615 = vbcast.lane.b32.xlu1 %v613_v43, 256  ;;  %608 = vbcast.lane.b32.xlu0 %v606_v45, 256 }
 0x22d   :  { %629 = vbcast.lane.b32.xlu1 %v627_v46, 256  ;;  %622 = vbcast.lane.b32.xlu0 %v620_v47, 256 }
 0x231   :  { %643 = vbcast.lane.b32.xlu1 %v641_v49, 256  ;;  %636 = vbcast.lane.b32.xlu0 %v634_v50, 256  ;;  %v570_v49 = vld [vmem:[%s1886_s0 + $0x1a] sm:$0x3]  ;;  %v569_v50 = vld [vmem:[%s1886_s0 + $0x18] sm:$0x3] }
 0x235   :  { %769 = vbcast.lane.b32.xlu1 %v767_v53, 256  ;;  %762 = vbcast.lane.b32.xlu0 %v760_v54, 256 }
 0x239   :  { %783 = vbcast.lane.b32.xlu1 %v781_v59, 256  ;;  %776 = vbcast.lane.b32.xlu0 %v774_v60, 256 }
 0x23d   :  { %797 = vbcast.lane.b32.xlu1 %v795_v61, 256  ;;  %790 = vbcast.lane.b32.xlu0 %v788_v0, 256  ;;  %v572_v0 = vld [vmem:[%s1886_s0 + $0x1e] sm:$0x3] }
 0x241   :  { %811 = vbcast.lane.b32.xlu1 %v809_v1, 256  ;;  %804 = vbcast.lane.b32.xlu0 %v802_v2, 256  ;;  %v571_v1 = vld [vmem:[%s1886_s0 + $0x1c] sm:$0x3] }
 0x245   :  { %713 = vbcast.lane.b32.xlu1 %v711_v4, 256  ;;  %706 = vbcast.lane.b32.xlu0 %v704_v5, 256 }
 0x249   :  { %727 = vbcast.lane.b32.xlu1 %v725_v6, 256  ;;  %720 = vbcast.lane.b32.xlu0 %v718_v7, 256 }
 0x24b   :  { %v914_v8 = vpop.permute.xlu1 %913  ;;  %v907_v9 = vpop.permute.xlu0 %906 }
 0x24d   :  { %741 = vbcast.lane.b32.xlu1 %v739_v10, 256  ;;  %734 = vbcast.lane.b32.xlu0 %v732_v11, 256 }
 0x24f   :  { %v928_v12 = vpop.permute.xlu1 %927  ;;  %v921_v38 = vpop.permute.xlu0 %920 }
 0x251   :  { %755 = vbcast.lane.b32.xlu1 %v753_v39, 256  ;;  %748 = vbcast.lane.b32.xlu0 %v746_v13, 256 }
 0x253   :  { %v942_v44 = vpop.permute.xlu1 %941  ;;  %v935_v48 = vpop.permute.xlu0 %934 }
 0x255   :  { %1067 = vbcast.lane.b32.xlu1 %v1065_v62, 256  ;;  %1060 = vbcast.lane.b32.xlu0 %v1058_v63, 256 }
 0x257   :  { %v1581_v52 = vpop.permute.xlu1 %955  ;;  %v1583_v55 = vpop.permute.xlu0 %948 }
 0x25b   :  { %v1585_v14 = vpop.permute.xlu1 %857  ;;  %v1587_v15 = vpop.permute.xlu0 %850 }
 0x25f   :  { %v1589_v16 = vpop.permute.xlu1 %871  ;;  %v1591_v17 = vpop.permute.xlu0 %864 }
 0x263   :  { %v1593_v18 = vpop.permute.xlu1 %885  ;;  %v1595_v57 = vpop.permute.xlu0 %878 }
 0x267   :  { %v1597_v62 = vpop.permute.xlu1 %899  ;;  %v1599_v56 = vpop.permute.xlu0 %892 }
 0x26b   :  { %v1601_v58 = vpop.permute.xlu1 %1025  ;;  %v1603_v63 = vpop.permute.xlu0 %1018 }
 0x26f   :  { %v1605_v19 = vpop.permute.xlu1 %1039  ;;  %v1607_v20 = vpop.permute.xlu0 %1032 }
 0x273   :  { %v1609_v21 = vpop.permute.xlu1 %1053  ;;  %v1611_v22 = vpop.permute.xlu0 %1046 }
 0x277   :  { %v1613_v23 = vpop.permute.xlu1 %969  ;;  %v1615_v24 = vpop.permute.xlu0 %962 }
 0x27b   :  { %v1617_v25 = vpop.permute.xlu1 %983  ;;  %v1619_v26 = vpop.permute.xlu0 %976 }
 0x27f   :  { %v1621_v27 = vpop.permute.xlu1 %997  ;;  %v1623_v28 = vpop.permute.xlu0 %990 }
 0x283   :  { %v1625_v29 = vpop.permute.xlu1 %1011  ;;  %v1627_v30 = vpop.permute.xlu0 %1004 }
 0x287   :  { %v658_v33 = vpop.permute.xlu1 %657  ;;  %v651_v34 = vpop.permute.xlu0 %650 }
 0x288   :  { %v822_v35 = vmul.f32 %v658_v33, %v566_v31  ;;  %v821_v36 = vmul.f32 %v651_v34, %v565_v32 }
 0x28a   :  { %v1078_v41 = vadd.f32 %v914_v8, %v822_v35  ;;  %v1077_v42 = vadd.f32 %v907_v9, %v821_v36  ;;  %v558_v8 = vld [vmem:[%s1886_s0 + $0x2] sm:$0x3]  ;;  %v557_v9 = vld [vmem:[%s1886_s0] sm:$0x3] }
 0x28b   :  { %v672_v43 = vpop.permute.xlu1 %671  ;;  %v665_v45 = vpop.permute.xlu0 %664 }
 0x28c   :  { %1111 = vst.msk [vmem:[%s1887_s10 + $0x12] sm:$0x3] %vm1101_vm2, %v1078_v41  ;;  %1110 = vst.msk [vmem:[%s1887_s10 + $0x10] sm:$0x3] %vm1101_vm2, %v1077_v42  ;;  %v824_v46 = vmul.f32 %v672_v43, %v568_v37  ;;  %v823_v47 = vmul.f32 %v665_v45, %v567_v40 }
 0x28e   :  { %v1080_v51 = vadd.f32 %v928_v12, %v824_v46  ;;  %v1079_v53 = vadd.f32 %v921_v38, %v823_v47 }
 0x28f   :  { %v686_v54 = vpop.permute.xlu1 %685  ;;  %v679_v59 = vpop.permute.xlu0 %678 }
 0x290   :  { %1113 = vst.msk [vmem:[%s1887_s10 + $0x16] sm:$0x3] %vm1101_vm2, %v1080_v51  ;;  %1112 = vst.msk [vmem:[%s1887_s10 + $0x14] sm:$0x3] %vm1101_vm2, %v1079_v53  ;;  %v826_v60 = vmul.f32 %v686_v54, %v570_v49  ;;  %v825_v61 = vmul.f32 %v679_v59, %v569_v50 }
 0x292   :  { %v1082_v2 = vadd.f32 %v942_v44, %v826_v60  ;;  %v1081_v3 = vadd.f32 %v935_v48, %v825_v61  ;;  %v560_v44 = vld [vmem:[%s1886_s0 + $0x6] sm:$0x3]  ;;  %v559_v48 = vld [vmem:[%s1886_s0 + $0x4] sm:$0x3] }
 0x293   :  { %v700_v4 = vpop.permute.xlu1 %699  ;;  %v693_v5 = vpop.permute.xlu0 %692 }
 0x294   :  { %1115 = vst.msk [vmem:[%s1887_s10 + $0x1a] sm:$0x3] %vm1101_vm2, %v1082_v2  ;;  %1114 = vst.msk [vmem:[%s1887_s10 + $0x18] sm:$0x3] %vm1101_vm2, %v1081_v3  ;;  %v828_v6 = vmul.f32 %v700_v4, %v572_v0  ;;  %v827_v7 = vmul.f32 %v693_v5, %v571_v1 }
 0x296   :  { %v1084_v10 = vadd.f32 %v1581_v52, %v828_v6  ;;  %v1083_v11 = vadd.f32 %v1583_v55, %v827_v7 }
 0x297   :  { %v602_v12 = vpop.permute.xlu1 %601  ;;  %v595_v38 = vpop.permute.xlu0 %594 }
 0x298   :  { %1117 = vst.msk [vmem:[%s1887_s10 + $0x1e] sm:$0x3] %vm1101_vm2, %v1084_v10  ;;  %1116 = vst.msk [vmem:[%s1887_s10 + $0x1c] sm:$0x3] %vm1101_vm2, %v1083_v11  ;;  %v814_v39 = vmul.f32 %v602_v12, %v558_v8  ;;  %v813_v13 = vmul.f32 %v595_v38, %v557_v9 }
 0x29a   :  { %v1070_v52 = vadd.f32 %v1585_v14, %v814_v39  ;;  %v1069_v55 = vadd.f32 %v1587_v15, %v813_v13  ;;  %v562_v14 = vld [vmem:[%s1886_s0 + $0xa] sm:$0x3]  ;;  %v561_v15 = vld [vmem:[%s1886_s0 + $0x8] sm:$0x3]  ;;  %v574_v39 = vld [vmem:[%s1886_s0 + $0x22] sm:$0x3] }
 0x29b   :  { %v616_v31 = vpop.permute.xlu1 %615  ;;  %v609_v32 = vpop.permute.xlu0 %608 }
 0x29c   :  { %1103 = vst.msk [vmem:[%s1887_s10 + $0x2] sm:$0x3] %vm1101_vm2, %v1070_v52  ;;  %1102 = vst.msk [vmem:[%s1887_s10] sm:$0x3] %vm1101_vm2, %v1069_v55  ;;  %v816_v33 = vmul.f32 %v616_v31, %v560_v44  ;;  %v815_v34 = vmul.f32 %v609_v32, %v559_v48  ;;  %v576_v52 = vld [vmem:[%s1886_s0 + $0x26] sm:$0x3] }
 0x29d   :  { %v575_v55 = vld [vmem:[%s1886_s0 + $0x24] sm:$0x3] }
 0x29e   :  { %v1072_v35 = vadd.f32 %v1589_v16, %v816_v33  ;;  %v1071_v36 = vadd.f32 %v1591_v17, %v815_v34  ;;  %v564_v16 = vld [vmem:[%s1886_s0 + $0xe] sm:$0x3]  ;;  %v563_v17 = vld [vmem:[%s1886_s0 + $0xc] sm:$0x3] }
 0x29f   :  { %v630_v37 = vpop.permute.xlu1 %629  ;;  %v623_v40 = vpop.permute.xlu0 %622 }
 0x2a0   :  { %1105 = vst.msk [vmem:[%s1887_s10 + $0x6] sm:$0x3] %vm1101_vm2, %v1072_v35  ;;  %1104 = vst.msk [vmem:[%s1887_s10 + $0x4] sm:$0x3] %vm1101_vm2, %v1071_v36  ;;  %v818_v41 = vmul.f32 %v630_v37, %v562_v14  ;;  %v817_v42 = vmul.f32 %v623_v40, %v561_v15 }
 0x2a2   :  { %v1074_v43 = vadd.f32 %v1593_v18, %v818_v41  ;;  %v1073_v45 = vadd.f32 %v1595_v57, %v817_v42  ;;  %v582_v18 = vld [vmem:[%s1886_s0 + $0x32] sm:$0x3]  ;;  %v581_v57 = vld [vmem:[%s1886_s0 + $0x30] sm:$0x3] }
 0x2a3   :  { %v644_v46 = vpop.permute.xlu1 %643  ;;  %v637_v47 = vpop.permute.xlu0 %636 }
 0x2a4   :  { %1107 = vst.msk [vmem:[%s1887_s10 + $0xa] sm:$0x3] %vm1101_vm2, %v1074_v43  ;;  %1106 = vst.msk [vmem:[%s1887_s10 + $0x8] sm:$0x3] %vm1101_vm2, %v1073_v45  ;;  %v820_v49 = vmul.f32 %v644_v46, %v564_v16  ;;  %v819_v50 = vmul.f32 %v637_v47, %v563_v17  ;;  %v588_v43 = vld [vmem:[%s1886_s0 + $0x3e] sm:$0x3] }
 0x2a5   :  { %v587_v45 = vld [vmem:[%s1886_s0 + $0x3c] sm:$0x3] }
 0x2a6   :  { %v1076_v51 = vadd.f32 %v1597_v62, %v820_v49  ;;  %v1075_v53 = vadd.f32 %v1599_v56, %v819_v50  ;;  %v584_v62 = vld [vmem:[%s1886_s0 + $0x36] sm:$0x3]  ;;  %v583_v56 = vld [vmem:[%s1886_s0 + $0x34] sm:$0x3] }
 0x2a7   :  { %v770_v54 = vpop.permute.xlu1 %769  ;;  %v763_v59 = vpop.permute.xlu0 %762 }
 0x2a8   :  { %1109 = vst.msk [vmem:[%s1887_s10 + $0xe] sm:$0x3] %vm1101_vm2, %v1076_v51  ;;  %1108 = vst.msk [vmem:[%s1887_s10 + $0xc] sm:$0x3] %vm1101_vm2, %v1075_v53  ;;  %v838_v60 = vmul.f32 %v770_v54, %v582_v18  ;;  %v837_v61 = vmul.f32 %v763_v59, %v581_v57 }
 0x2aa   :  { %v1094_v0 = vadd.f32 %v1601_v58, %v838_v60  ;;  %v1093_v1 = vadd.f32 %v1603_v63, %v837_v61  ;;  %v586_v58 = vld [vmem:[%s1886_s0 + $0x3a] sm:$0x3]  ;;  %v585_v63 = vld [vmem:[%s1886_s0 + $0x38] sm:$0x3] }
 0x2ab   :  { %v784_v2 = vpop.permute.xlu1 %783  ;;  %v777_v3 = vpop.permute.xlu0 %776 }
 0x2ac   :  { %1127 = vst.msk [vmem:[%s1887_s10 + $0x32] sm:$0x3] %vm1101_vm2, %v1094_v0  ;;  %1126 = vst.msk [vmem:[%s1887_s10 + $0x30] sm:$0x3] %vm1101_vm2, %v1093_v1  ;;  %v840_v4 = vmul.f32 %v784_v2, %v584_v62  ;;  %v839_v5 = vmul.f32 %v777_v3, %v583_v56 }
 0x2ae   :  { %v1096_v6 = vadd.f32 %v1605_v19, %v840_v4  ;;  %v1095_v7 = vadd.f32 %v1607_v20, %v839_v5 }
 0x2af   :  { %v798_v8 = vpop.permute.xlu1 %797  ;;  %v791_v9 = vpop.permute.xlu0 %790 }
 0x2b0   :  { %1129 = vst.msk [vmem:[%s1887_s10 + $0x36] sm:$0x3] %vm1101_vm2, %v1096_v6  ;;  %1128 = vst.msk [vmem:[%s1887_s10 + $0x34] sm:$0x3] %vm1101_vm2, %v1095_v7  ;;  %v842_v10 = vmul.f32 %v798_v8, %v586_v58  ;;  %v841_v11 = vmul.f32 %v791_v9, %v585_v63 }
 0x2b2   :  { %v1098_v12 = vadd.f32 %v1609_v21, %v842_v10  ;;  %v1097_v19 = vadd.f32 %v1611_v22, %v841_v11  ;;  %v573_v21 = vld [vmem:[%s1886_s0 + $0x20] sm:$0x3] }
 0x2b3   :  { %v812_v38 = vpop.permute.xlu1 %811  ;;  %v805_v20 = vpop.permute.xlu0 %804 }
 0x2b4   :  { %1131 = vst.msk [vmem:[%s1887_s10 + $0x3a] sm:$0x3] %vm1101_vm2, %v1098_v12  ;;  %1130 = vst.msk [vmem:[%s1887_s10 + $0x38] sm:$0x3] %vm1101_vm2, %v1097_v19  ;;  %v844_v49 = vmul.f32 %v812_v38, %v588_v43  ;;  %v843_v50 = vmul.f32 %v805_v20, %v587_v45 }
 0x2b7   :  { %v714_v22 = vpop.permute.xlu1 %713  ;;  %v707_v13 = vpop.permute.xlu0 %706 }
 0x2b8   :  { %v830_v44 = vmul.f32 %v714_v22, %v574_v39  ;;  %v829_v48 = vmul.f32 %v707_v13, %v573_v21 }
 0x2ba   :  { %v1086_v31 = vadd.f32 %v1613_v23, %v830_v44  ;;  %v1085_v32 = vadd.f32 %v1615_v24, %v829_v48  ;;  %v578_v23 = vld [vmem:[%s1886_s0 + $0x2a] sm:$0x3]  ;;  %v577_v24 = vld [vmem:[%s1886_s0 + $0x28] sm:$0x3] }
 0x2bb   :  { %v728_v33 = vpop.permute.xlu1 %727  ;;  %v721_v34 = vpop.permute.xlu0 %720 }
 0x2bc   :  { %1119 = vst.msk [vmem:[%s1887_s10 + $0x22] sm:$0x3] %vm1101_vm2, %v1086_v31  ;;  %1118 = vst.msk [vmem:[%s1887_s10 + $0x20] sm:$0x3] %vm1101_vm2, %v1085_v32  ;;  %v832_v14 = vmul.f32 %v728_v33, %v576_v52  ;;  %v831_v15 = vmul.f32 %v721_v34, %v575_v55 }
 0x2be   :  { %v1088_v35 = vadd.f32 %v1617_v25, %v832_v14  ;;  %v1087_v36 = vadd.f32 %v1619_v26, %v831_v15  ;;  %v580_v25 = vld [vmem:[%s1886_s0 + $0x2e] sm:$0x3]  ;;  %v579_v26 = vld [vmem:[%s1886_s0 + $0x2c] sm:$0x3] }
 0x2bf   :  { %v742_v37 = vpop.permute.xlu1 %741  ;;  %v735_v40 = vpop.permute.xlu0 %734 }
 0x2c0   :  { %1121 = vst.msk [vmem:[%s1887_s10 + $0x26] sm:$0x3] %vm1101_vm2, %v1088_v35  ;;  %1120 = vst.msk [vmem:[%s1887_s10 + $0x24] sm:$0x3] %vm1101_vm2, %v1087_v36  ;;  %v834_v41 = vmul.f32 %v742_v37, %v578_v23  ;;  %v833_v42 = vmul.f32 %v735_v40, %v577_v24 }
 0x2c2   :  { %v1090_v16 = vadd.f32 %v1621_v27, %v834_v41  ;;  %v1089_v17 = vadd.f32 %v1623_v28, %v833_v42 }
 0x2c3   :  { %v756_v46 = vpop.permute.xlu1 %755  ;;  %v749_v47 = vpop.permute.xlu0 %748 }
 0x2c4   :  { %1123 = vst.msk [vmem:[%s1887_s10 + $0x2a] sm:$0x3] %vm1101_vm2, %v1090_v16  ;;  %1122 = vst.msk [vmem:[%s1887_s10 + $0x28] sm:$0x3] %vm1101_vm2, %v1089_v17  ;;  %v836_v27 = vmul.f32 %v756_v46, %v580_v25  ;;  %v835_v28 = vmul.f32 %v749_v47, %v579_v26 }
 0x2c6   :  { %v1092_v18 = vadd.f32 %v1625_v29, %v836_v27  ;;  %v1091_v57 = vadd.f32 %v1627_v30, %v835_v28 }
 0x2c7   :  { %v1068_v51 = vpop.permute.xlu1 %1067  ;;  %v1061_v53 = vpop.permute.xlu0 %1060 }
 0x2c8   :  { %1125 = vst.msk [vmem:[%s1887_s10 + $0x2e] sm:$0x3] %vm1101_vm2, %v1092_v18  ;;  %1124 = vst.msk [vmem:[%s1887_s10 + $0x2c] sm:$0x3] %vm1101_vm2, %v1091_v57  ;;  %v1100_v54 = vadd.f32 %v1068_v51, %v844_v49  ;;  %v1099_v59 = vadd.f32 %v1061_v53, %v843_v50 }
 0x2ca   :  { %1133 = vst.msk [vmem:[%s1887_s10 + $0x3e] sm:$0x3] %vm1101_vm2, %v1100_v54  ;;  %1132 = vst.msk [vmem:[%s1887_s10 + $0x3c] sm:$0x3] %vm1101_vm2, %v1099_v59 }

// kernel: jscc_encoder_forward.19
= control target key start
LH: loop header
LB: loop body
LE: loop exit
PB: predicated region body
PF: predicated region fallthrough
CT: control target
= control target key end

     0   :  { %v350_v1 = vmov 0.0   ;;  %vm351_vm0 = vmmov 0   ;;  %v352_v5 = vmov 0   ;;  %v353_v7 = vmov 1983009808   ;;  %s437_s1 = inlined_call_operand.vmem [shape: bf16[288,128], index: 1, kind: input, shape index: {}]   ;;  %s438_s0 = inlined_call_operand.vmem [shape: bf16[4,288], index: 0, kind: input, shape index: {}]   ;;  %s439_s2 = inlined_call_operand.vmem [shape: f32[4,1], index: 2, kind: input, shape index: {}]   ;;  %s440_s3 = inlined_call_operand.vmem [shape: f32[4,128], index: 3, kind: output, shape index: {}]  }
   0x1   :  { %v331_v0 = vld [vmem:[%s437_s1 + $0x40] sm:$0xff]   ;;  %318 = vmatprep.subr.bf16.mxu1 %v350_v1  ;;  %322 = vmatprep.mubr.msk.bf16.mxu1 %vm351_vm0, %v350_v1  ;;  %v333_v3 = vld [vmem:[%s437_s1 + $0x48] sm:$0xff]   ;;  %v335_v6 = vld [vmem:[%s437_s1 + $0x50] sm:$0xff]   ;;  %v61_v8 = vunpack.c.l.s4 %v353_v7  ;;  %v63_v9 = vlaneseq  ;;  %vm185_vm1 = vcmask 261120  }
   0x2   :  { %v332_v2 = vld [vmem:[%s437_s1] sm:$0xff]   ;;  %293 = vmatprep.subr.bf16.mxu0 %v331_v0  ;;  %v334_v4 = vld [vmem:[%s437_s1 + $0x8] sm:$0xff]   ;;  %330 = vset.pattern.permute.xlu0 %v352_v5  ;;  %v336_v10 = vld [vmem:[%s437_s1 + $0x10] sm:$0xff]  }
   0x3   :  { %294 = vmatpush3.bf16.msra.mxu0 %v332_v2  ;;  %v337_v11 = vld [vmem:[%s437_s1 + $0x58] sm:$0xff]   ;;  %v62_v12 = vunpack.c.0.s8 %v61_v8  ;;  %v64_v13 = vshrl.u32 %v63_v9, 7  ;;  %v339_v15 = vld [vmem:[%s437_s1 + $0x60] sm:$0xff]   ;;  %v341_v19 = vld [vmem:[%s437_s1 + $0x68] sm:$0xff]  }
   0x4   :  { %295 = vmatprep.subr.bf16.mxu0 %v333_v3  ;;  %v338_v14 = vld [vmem:[%s437_s1 + $0x18] sm:$0xff]   ;;  %v345_v16 = vld [vmem:[%s437_s1 + $0x80] sm:$0xff]   ;;  %v349_v23 = vld [vmem:[%s437_s1 + $0x88] sm:$0xff]  }
   0x5   :  { %v65_v17 = vsub.s32 %v62_v12, %v64_v13  ;;  %v340_v18 = vld [vmem:[%s437_s1 + $0x20] sm:$0xff]   ;;  %319 = vmatpush3.bf16.msra.mxu1 %v345_v16  ;;  %v342_v25 = vld [vmem:[%s437_s1 + $0x28] sm:$0xff]   ;;  %v343_v26 = vld [vmem:[%s437_s1 + $0x70] sm:$0xff]  }
   0x6   :  { %320 = vmatprep.subr.bf16.mxu1 %v350_v1  ;;  %v15_v20 = vld [vmem:[%s438_s0] sm:$0x3f]  ;;  %v344_v29 = vld [vmem:[%s437_s1 + $0x30] sm:$0xff]   ;;  %v346_v30 = vld [vmem:[%s437_s1 + $0x78] sm:$0xff]  }
   0x7   :  { %296 = vmatpush3.bf16.msra.mxu0 %v334_v4  ;;  %v59_v21 = vcombine.high %v15_v20, %v15_v20  ;;  %v66_v22 = vrot.slane %v15_v20, %v65_v17  ;;  %v52_v24 = vld [vmem:[%s439_s2] sm:$0xf]  ;;  %v347_v31 = vld [vmem:[%s437_s1 + $0x38] sm:$0xff]  }
   0x8   :  { %297 = vmatprep.subr.bf16.mxu0 %v335_v6  ;;  %55 = vperm.xlu0 %330, %v52_v24  }
   0x9   :  { %v73_v27 = vrot.slane %v59_v21, %v65_v17  ;;  %v74_v28 = vcombine.high %v66_v22, %v66_v22  ;;  %321 = vmatpush3.bf16.msra.mxu1 %v349_v23 }
   0xb   :  { %298 = vmatpush3.bf16.msra.mxu0 %v336_v10  ;;  %221 = vmatprep.mubr.bf16.mxu0 %v74_v28 }
   0xc   :  { %299 = vmatprep.subr.bf16.mxu0 %v337_v11  ;;  %323 = vmatmul.mubr.msk.bf16.vlgmr.msra.gmra.mrb[0].mxu1 %vm185_vm1, %v73_v27 }
   0xf   :  { %300 = vmatpush3.bf16.msra.mxu0 %v338_v14 }
  0x10   :  { %301 = vmatprep.subr.bf16.mxu0 %v339_v15 }
  0x13   :  { %302 = vmatpush3.bf16.msra.mxu0 %v340_v18 }
  0x14   :  { %303 = vmatprep.subr.bf16.mxu0 %v341_v19 }
  0x17   :  { %304 = vmatpush3.bf16.msra.mxu0 %v342_v25 }
  0x18   :  { %305 = vmatprep.subr.bf16.mxu0 %v343_v26 }
  0x1b   :  { %306 = vmatpush3.bf16.msra.mxu0 %v344_v29 }
  0x1c   :  { %307 = vmatprep.subr.bf16.mxu0 %v346_v30 }
  0x1f   :  { %308 = vmatpush3.bf16.msra.mxu0 %v347_v31 }
  0x22   :  { %222 = vmatmul.mubr.bf16.vlgmr.msra.gmra.mrb[0].mxu0 %v66_v22 }
  0x87   :  { %v56_v38 = vpop.permute.xlu0 %55 }
  0xdf   :  { %v263_v32 = vpop.f32.mrb[0].mxu1 }
  0xe0   :  { %v324_v33 = vpop.f32.mrb[1].mxu1 }
  0xe1   :  { %v266_v34 = vpop.f32.mrb[2].mxu1 }
  0xe2   :  { %v325_v35 = vpop.f32.mrb[3].mxu1 }
  0xf5   :  { %v309_v36 = vpop.f32.mrb[0].mxu0 }
  0xf6   :  { %v310_v37 = vpop.f32.mrb[1].mxu0 }
  0xf7   :  { %v311_v39 = vadd.f32 %v310_v37, %v309_v36  ;;  %v312_v40 = vpop.f32.mrb[2].mxu0 }
  0xf8   :  { %v313_v41 = vpop.f32.mrb[3].mxu0 }
  0xf9   :  { %v224_v42 = vadd.f32 %v311_v39, %v56_v38 }
  0xfb   :  { %v264_v43 = vadd.f32 %v263_v32, %v224_v42 }
  0xfd   :  { %269 = vst [vmem:[%s440_s3] sm:$0xf] %v264_v43 }

</bundles_post_ra>
